<compile_context>
chip_gen: v7x
topology: tpu7x:2x2x1
jax: 0.10.0
libtpu: 0.0.40
codegen_flags: <defaults>
</compile_context>

<pallas_src>
import functools

import jax
import jax.numpy as jnp
from jax.experimental import pallas as pl
from jax.experimental.pallas import tpu as pltpu


def _resblock_kernel(x_ref, w1_ref, g1_ref, bt1_ref, w2_ref, g2_ref, bt2_ref,
                     o_ref, patches_ref, *, H, W, NB, eps):
    """NB batch elements per grid step.

    Layout: channels on sublanes, NB*H*W spatial positions on lanes, so every vector
    op / store is lane-dense and each 3x3 conv is one MXU matmul.
    x_ref/o_ref: (NB, C, H*W); params are (C, 9C) / (C, 1); patches_ref: (9C, NB*H*W).
    """
    HW = H * W
    L = NB * HW
    C = x_ref.shape[1]
    inv_hw = 1.0 / HW

    # ---- lane -> (h, w) masks, built once at (1, L), broadcast over sublanes ----
    lane = jax.lax.broadcasted_iota(jnp.int32, (1, L), 1)
    if (W & (W - 1)) == 0 and (H & (H - 1)) == 0:
        wpos = lane & (W - 1)
        hpos = (lane >> (W.bit_length() - 1)) & (H - 1)
    else:
        wpos = lane % W
        hpos = (lane // W) % H
    w_first = wpos == 0
    w_last = wpos == (W - 1)
    h_first = hpos == 0
    h_last = hpos == (H - 1)

    # Batch elements concatenated along lanes: (C, NB*HW), lane-dense.
    x = x_ref[0] if NB == 1 else jnp.concatenate([x_ref[i] for i in range(NB)], axis=1)

    def conv3x3_reflect(a, w_flat):
        # pltpu.roll(v, s, axis=1)[:, p] == v[:, (p - s) % L].  Every lane where a roll
        # wraps across an image (or batch-segment) boundary is exactly a lane replaced
        # by a reflection fix-up below, so the halo stays correct for NB > 1.
        up = pltpu.roll(a, W, axis=1)        # value at (h-1, w)
        down = pltpu.roll(a, L - W, axis=1)  # value at (h+1, w)
        rows = (
            jnp.where(h_first, down, up),    # kh=0 (di=-1); reflect row -1 -> row 1
            a,                               # kh=1 (di= 0)
            jnp.where(h_last, up, down),     # kh=2 (di=+1); reflect row H -> row H-2
        )
        for kh, r in enumerate(rows):
            left = pltpu.roll(r, 1, axis=1)       # value at (., w-1)
            right = pltpu.roll(r, L - 1, axis=1)  # value at (., w+1)
            # Write each tap straight into the VMEM scratch (caps vreg pressure at ~1
            # tap, no 9-way sublane concat); row index = (kh*3 + kw)*C + ci.
            patches_ref[pl.ds((kh * 3 + 0) * C, C), :] = jnp.where(w_first, right, left)
            patches_ref[pl.ds((kh * 3 + 1) * C, C), :] = r
            patches_ref[pl.ds((kh * 3 + 2) * C, C), :] = jnp.where(w_last, left, right)
        # Conv bias intentionally omitted: a per-channel constant added here is exactly
        # cancelled by the InstanceNorm mean subtraction that always follows.
        return jnp.dot(w_flat, patches_ref[...], preferred_element_type=jnp.float32)

    def inorm_scale_shift(seg, gamma, beta):
        # Sum and sum-of-squares in one pass (independent lane reductions), affine
        # folded into a single scale/shift applied by the caller.
        s1 = jnp.sum(seg, axis=1, keepdims=True) * inv_hw          # mean      (C,1)
        s2 = jnp.sum(seg * seg, axis=1, keepdims=True) * inv_hw    # E[x^2]    (C,1)
        scale = gamma * jax.lax.rsqrt(s2 - s1 * s1 + eps)          # (C,1)
        shift = beta - s1 * scale                                  # (C,1)
        return scale, shift

    # ---- conv1 -> IN1 -> ReLU (per-image statistics over static lane segments) ----
    y = conv3x3_reflect(x, w1_ref[...])
    g1, bt1 = g1_ref[...], bt1_ref[...]
    segs = []
    for i in range(NB):
        seg = y if NB == 1 else y[:, i * HW:(i + 1) * HW]
        scale, shift = inorm_scale_shift(seg, g1, bt1)
        segs.append(jnp.maximum(seg * scale + shift, 0.0))
    y = segs[0] if NB == 1 else jnp.concatenate(segs, axis=1)

    # ---- conv2 -> IN2 -> + residual; stored per image as lane-dense (C, HW) slabs ----
    z = conv3x3_reflect(y, w2_ref[...])
    g2, bt2 = g2_ref[...], bt2_ref[...]
    for i in range(NB):
        seg = z if NB == 1 else z[:, i * HW:(i + 1) * HW]
        xseg = x if NB == 1 else x[:, i * HW:(i + 1) * HW]
        scale, shift = inorm_scale_shift(seg, g2, bt2)
        o_ref[i] = (seg * scale + shift + xseg).astype(o_ref.dtype)


def _pick_nb(n, max_nb):
    """Largest divisor of n <= max_nb, preferring an even grid length (v7x: 2 TCs)
    when that costs at most a 2x reduction in per-step batching."""
    divs = [d for d in range(1, n + 1) if n % d == 0 and d <= max_nb]
    best = max(divs)
    even = [d for d in divs if (n // d) % 2 == 0]
    if even and max(even) * 2 >= best:
        return max(even)
    return best


def residual_block(x_nchw, w1, b1, g1, bt1, w2, b2, g2, bt2, *, eps=1e-5,
                   max_batch_per_step=8):
    """Forward pass of ResidualBlock.

    x_nchw: (N, C, H, W) float32
    w1, w2: (C, C, 3, 3) PyTorch Conv2d weights; b1, b2: (C,) conv biases
            (biases are mathematically cancelled by the following InstanceNorm and are
             therefore not passed into the kernel)
    g1, bt1, g2, bt2: (C,) InstanceNorm2d affine weight/bias
    returns: (N, C, H, W) float32
    """
    n, c, h, w = x_nchw.shape
    hw = h * w
    assert h >= 2 and w >= 2, "ReflectionPad2d(1) requires H, W >= 2"
    assert w1.shape == w2.shape == (c, c, 3, 3)
    del b1, b2  # exactly cancelled by InstanceNorm mean subtraction (see kernel)

    nb = _pick_nb(n, max_batch_per_step)
    grid = n // nb

    x_flat = x_nchw.reshape(n, c, hw)

    def flat_w(wt):  # (Cout, Cin, 3, 3) -> (Cout, 9*Cin); row = (kh*3+kw)*Cin + ci
        return jnp.transpose(wt, (0, 2, 3, 1)).reshape(c, 9 * c)

    def col(v):      # per-channel params as (C, 1) so they broadcast over lanes
        return v.reshape(c, 1)

    kernel = functools.partial(_resblock_kernel, H=h, W=w, NB=nb, eps=eps)

    def full_spec(shape):
        return pl.BlockSpec(shape, lambda b: (0,) * len(shape))

    # Advisory cost estimate (two MXU matmuls per image dominate the flops).
    flops = 2 * 2 * c * (9 * c) * hw * n
    bytes_accessed = 2 * n * c * hw * 4 + (2 * 9 * c * c + 4 * c) * 4
    cost = pl.CostEstimate(flops=flops, transcendentals=4 * n * c,
                           bytes_accessed=bytes_accessed)

    # Explicit VMEM budget: double-buffered in/out blocks + params + im2col scratch.
    block_bytes = nb * c * hw * 4
    param_bytes = (2 * 9 * c * c + 4 * c) * 4
    scratch_bytes = 9 * c * nb * hw * 4
    vmem_need = 4 * block_bytes + 2 * param_bytes + scratch_bytes + (1 << 20)
    vmem_limit = int(min(64 << 20, max(32 << 20, 2 * vmem_need)))

    out_flat = pl.pallas_call(
        kernel,
        out_shape=jax.ShapeDtypeStruct((n, c, hw), x_nchw.dtype),
        grid_spec=pltpu.PrefetchScalarGridSpec(
            num_scalar_prefetch=0,
            grid=(grid,),
            in_specs=[
                pl.BlockSpec((nb, c, hw), lambda b: (b, 0, 0)),  # x
                full_spec((c, 9 * c)),  # w1_flat
                full_spec((c, 1)),      # gamma1
                full_spec((c, 1)),      # beta1
                full_spec((c, 9 * c)),  # w2_flat
                full_spec((c, 1)),      # gamma2
                full_spec((c, 1)),      # beta2
            ],
            out_specs=pl.BlockSpec((nb, c, hw), lambda b: (b, 0, 0)),
            scratch_shapes=[pltpu.VMEM((9 * c, nb * hw), jnp.float32)],
        ),
        compiler_params=pltpu.CompilerParams(
            dimension_semantics=("parallel",),
            vmem_limit_bytes=vmem_limit,
        ),
        cost_estimate=cost,
    )(x_flat, flat_w(w1), col(g1), col(bt1), flat_w(w2), col(g2), col(bt2))

    return out_flat.reshape(n, c, h, w)


def _reference(x, w1, b1, g1, bt1, w2, b2, g2, bt2, *, eps=1e-5):
    """Pure-JAX reference (reflect pad + lax conv WITH bias + instance norm)."""
    def conv(v, wt, b):
        vp = jnp.pad(v, ((0, 0), (0, 0), (1, 1), (1, 1)), mode="reflect")
        y = jax.lax.conv_general_dilated(
            vp, wt, window_strides=(1, 1), padding="VALID",
            dimension_numbers=("NCHW", "OIHW", "NCHW"),
            precision=jax.lax.Precision.HIGHEST)
        return y + b[None, :, None, None]

    def inorm(y, g, bt):
        mean = jnp.mean(y, axis=(2, 3), keepdims=True)
        var = jnp.mean((y - mean) ** 2, axis=(2, 3), keepdims=True)
        return ((y - mean) * jax.lax.rsqrt(var + eps)
                * g[None, :, None, None] + bt[None, :, None, None])

    out = jax.nn.relu(inorm(conv(x, w1, b1), g1, bt1))
    out = inorm(conv(out, w2, b2), g2, bt2)
    return out + x


if __name__ == "__main__":
    # ResidualBlock(channels): conv3x3 same-channels, stride 1, reflection pad 1.
    channels, N, H, W = 8, 4, 16, 16   # N=4 -> Nb=2 per step, grid=2 (even, both TCs)

    key = jax.random.PRNGKey(0)
    ks = jax.random.split(key, 9)
    x = jax.random.normal(ks[0], (N, channels, H, W), dtype=jnp.float32)
    w1 = 0.1 * jax.random.normal(ks[1], (channels, channels, 3, 3), dtype=jnp.float32)
    b1 = 0.1 * jax.random.normal(ks[2], (channels,), dtype=jnp.float32)
    g1 = 1.0 + 0.1 * jax.random.normal(ks[3], (channels,), dtype=jnp.float32)
    bt1 = 0.1 * jax.random.normal(ks[4], (channels,), dtype=jnp.float32)
    w2 = 0.1 * jax.random.normal(ks[5], (channels, channels, 3, 3), dtype=jnp.float32)
    b2 = 0.1 * jax.random.normal(ks[6], (channels,), dtype=jnp.float32)
    g2 = 1.0 + 0.1 * jax.random.normal(ks[7], (channels,), dtype=jnp.float32)
    bt2 = 0.1 * jax.random.normal(ks[8], (channels,), dtype=jnp.float32)

    out = residual_block(x, w1, b1, g1, bt1, w2, b2, g2, bt2)
    out = jax.block_until_ready(out)

    ref = _reference(x, w1, b1, g1, bt1, w2, b2, g2, bt2)
    assert out.shape == ref.shape == (N, channels, H, W)
    max_err = float(jnp.max(jnp.abs(out - ref)))
    assert jnp.allclose(out, ref, atol=1e-3, rtol=1e-3), f"max_err={max_err}"

    print("KERNEL_OK")
</pallas_src>

<mosaic_0001>
module attributes {stable_mosaic.version = 11 : i64} {
  func.func @_resblock_kernel(%arg0: i32, %arg1: memref<2x8x256xf32, #tpu.memory_space<vmem>>, %arg2: memref<8x72xf32, #tpu.memory_space<vmem>>, %arg3: memref<8x1xf32, #tpu.memory_space<vmem>>, %arg4: memref<8x1xf32, #tpu.memory_space<vmem>>, %arg5: memref<8x72xf32, #tpu.memory_space<vmem>>, %arg6: memref<8x1xf32, #tpu.memory_space<vmem>>, %arg7: memref<8x1xf32, #tpu.memory_space<vmem>>, %arg8: memref<2x8x256xf32, #tpu.memory_space<vmem>>, %arg9: memref<72x512xf32, #tpu.memory_space<vmem>>) attributes {dimension_semantics = [#tpu.dimension_semantics<parallel>], iteration_bounds = array<i64: 2>, scalar_prefetch = 0 : i64, scratch_operands = 1 : i64, tpu.core_type = #tpu.core_type<tc>, window_params = [{transform_indices = @transform_0, window_bounds = array<i64: 2, 8, 256>}, {pipeline_mode = #tpu.pipeline_mode<synchronous>, transform_indices = @transform_1, window_bounds = array<i64: 8, 72>}, {pipeline_mode = #tpu.pipeline_mode<synchronous>, transform_indices = @transform_2, window_bounds = array<i64: 8, 1>}, {pipeline_mode = #tpu.pipeline_mode<synchronous>, transform_indices = @transform_3, window_bounds = array<i64: 8, 1>}, {pipeline_mode = #tpu.pipeline_mode<synchronous>, transform_indices = @transform_4, window_bounds = array<i64: 8, 72>}, {pipeline_mode = #tpu.pipeline_mode<synchronous>, transform_indices = @transform_5, window_bounds = array<i64: 8, 1>}, {pipeline_mode = #tpu.pipeline_mode<synchronous>, transform_indices = @transform_6, window_bounds = array<i64: 8, 1>}, {transform_indices = @transform_7, window_bounds = array<i64: 2, 8, 256>}]} {
    %0 = tpu.iota {dimensions = array<i32: 1>} : vector<1x512xi32>
    %c15_i32 = arith.constant 15 : i32
    %1 = vector.broadcast %c15_i32 : i32 to vector<1x512xi32>
    %2 = arith.andi %0, %1 : vector<1x512xi32>
    %c4_i32 = arith.constant 4 : i32
    %3 = vector.broadcast %c4_i32 : i32 to vector<1x512xi32>
    %4 = arith.shrsi %0, %3 : vector<1x512xi32>
    %c15_i32_0 = arith.constant 15 : i32
    %5 = vector.broadcast %c15_i32_0 : i32 to vector<1x512xi32>
    %6 = arith.andi %4, %5 : vector<1x512xi32>
    %c0_i32 = arith.constant 0 : i32
    %7 = vector.broadcast %c0_i32 : i32 to vector<1x512xi32>
    %8 = arith.cmpi eq, %2, %7 : vector<1x512xi32>
    %c15_i32_1 = arith.constant 15 : i32
    %9 = vector.broadcast %c15_i32_1 : i32 to vector<1x512xi32>
    %10 = arith.cmpi eq, %2, %9 : vector<1x512xi32>
    %c0_i32_2 = arith.constant 0 : i32
    %11 = vector.broadcast %c0_i32_2 : i32 to vector<1x512xi32>
    %12 = arith.cmpi eq, %6, %11 : vector<1x512xi32>
    %c15_i32_3 = arith.constant 15 : i32
    %13 = vector.broadcast %c15_i32_3 : i32 to vector<1x512xi32>
    %14 = arith.cmpi eq, %6, %13 : vector<1x512xi32>
    %c0 = arith.constant 0 : index
    %c0_4 = arith.constant 0 : index
    %c0_5 = arith.constant 0 : index
    %15 = vector.load %arg1[%c0, %c0_4, %c0_5] : memref<2x8x256xf32, #tpu.memory_space<vmem>>, vector<1x8x256xf32>
    %16 = vector.shape_cast %15 : vector<1x8x256xf32> to vector<8x256xf32>
    %c1 = arith.constant 1 : index
    %c0_6 = arith.constant 0 : index
    %c0_7 = arith.constant 0 : index
    %17 = vector.load %arg1[%c1, %c0_6, %c0_7] : memref<2x8x256xf32, #tpu.memory_space<vmem>>, vector<1x8x256xf32>
    %18 = vector.shape_cast %17 : vector<1x8x256xf32> to vector<8x256xf32>
    %19 = tpu.concatenate %16, %18 in 1 : vector<8x256xf32>, vector<8x256xf32> -> vector<8x512xf32>
    %c0_8 = arith.constant 0 : index
    %c0_9 = arith.constant 0 : index
    %20 = vector.load %arg2[%c0_8, %c0_9] : memref<8x72xf32, #tpu.memory_space<vmem>>, vector<8x72xf32>
    %c16_i32 = arith.constant 16 : i32
    %21 = tpu.dynamic_rotate %19 by %c16_i32 dim 1 : vector<8x512xf32>, i32 -> vector<8x512xf32>
    %c496_i32 = arith.constant 496 : i32
    %22 = tpu.dynamic_rotate %19 by %c496_i32 dim 1 : vector<8x512xf32>, i32 -> vector<8x512xf32>
    %23 = vector.shape_cast %12 : vector<1x512xi1> to vector<1x512xi1>
    %24 = vector.broadcast %23 : vector<1x512xi1> to vector<8x512xi1>
    %25 = arith.select %24, %22, %21 : vector<8x512xi1>, vector<8x512xf32>
    %26 = vector.shape_cast %14 : vector<1x512xi1> to vector<1x512xi1>
    %27 = vector.broadcast %26 : vector<1x512xi1> to vector<8x512xi1>
    %28 = arith.select %27, %21, %22 : vector<8x512xi1>, vector<8x512xf32>
    %c1_i32 = arith.constant 1 : i32
    %29 = tpu.dynamic_rotate %25 by %c1_i32 dim 1 : vector<8x512xf32>, i32 -> vector<8x512xf32>
    %c511_i32 = arith.constant 511 : i32
    %30 = tpu.dynamic_rotate %25 by %c511_i32 dim 1 : vector<8x512xf32>, i32 -> vector<8x512xf32>
    %31 = vector.shape_cast %8 : vector<1x512xi1> to vector<1x512xi1>
    %32 = vector.broadcast %31 : vector<1x512xi1> to vector<8x512xi1>
    %33 = arith.select %32, %30, %29 : vector<8x512xi1>, vector<8x512xf32>
    %c0_10 = arith.constant 0 : index
    %c0_11 = arith.constant 0 : index
    %34 = vector.load %arg9[%c0_10, %c0_11] : memref<72x512xf32, #tpu.memory_space<vmem>>, vector<8x512xf32>
    tpu.vector_store %arg9[%c0_10, %c0_11], %33 {strides = array<i32>} : memref<72x512xf32, #tpu.memory_space<vmem>>, vector<8x512xf32>,
    %c8 = arith.constant 8 : index
    %c0_12 = arith.constant 0 : index
    %35 = vector.load %arg9[%c8, %c0_12] : memref<72x512xf32, #tpu.memory_space<vmem>>, vector<8x512xf32>
    tpu.vector_store %arg9[%c8, %c0_12], %25 {strides = array<i32>} : memref<72x512xf32, #tpu.memory_space<vmem>>, vector<8x512xf32>,
    %36 = vector.shape_cast %10 : vector<1x512xi1> to vector<1x512xi1>
    %37 = vector.broadcast %36 : vector<1x512xi1> to vector<8x512xi1>
    %38 = arith.select %37, %29, %30 : vector<8x512xi1>, vector<8x512xf32>
    %c16 = arith.constant 16 : index
    %c0_13 = arith.constant 0 : index
    %39 = vector.load %arg9[%c16, %c0_13] : memref<72x512xf32, #tpu.memory_space<vmem>>, vector<8x512xf32>
    tpu.vector_store %arg9[%c16, %c0_13], %38 {strides = array<i32>} : memref<72x512xf32, #tpu.memory_space<vmem>>, vector<8x512xf32>,
    %c1_i32_14 = arith.constant 1 : i32
    %40 = tpu.dynamic_rotate %19 by %c1_i32_14 dim 1 : vector<8x512xf32>, i32 -> vector<8x512xf32>
    %c511_i32_15 = arith.constant 511 : i32
    %41 = tpu.dynamic_rotate %19 by %c511_i32_15 dim 1 : vector<8x512xf32>, i32 -> vector<8x512xf32>
    %42 = vector.shape_cast %8 : vector<1x512xi1> to vector<1x512xi1>
    %43 = vector.broadcast %42 : vector<1x512xi1> to vector<8x512xi1>
    %44 = arith.select %43, %41, %40 : vector<8x512xi1>, vector<8x512xf32>
    %c24 = arith.constant 24 : index
    %c0_16 = arith.constant 0 : index
    %45 = vector.load %arg9[%c24, %c0_16] : memref<72x512xf32, #tpu.memory_space<vmem>>, vector<8x512xf32>
    tpu.vector_store %arg9[%c24, %c0_16], %44 {strides = array<i32>} : memref<72x512xf32, #tpu.memory_space<vmem>>, vector<8x512xf32>,
    %c32 = arith.constant 32 : index
    %c0_17 = arith.constant 0 : index
    %46 = vector.load %arg9[%c32, %c0_17] : memref<72x512xf32, #tpu.memory_space<vmem>>, vector<8x512xf32>
    tpu.vector_store %arg9[%c32, %c0_17], %19 {strides = array<i32>} : memref<72x512xf32, #tpu.memory_space<vmem>>, vector<8x512xf32>,
    %47 = vector.shape_cast %10 : vector<1x512xi1> to vector<1x512xi1>
    %48 = vector.broadcast %47 : vector<1x512xi1> to vector<8x512xi1>
    %49 = arith.select %48, %40, %41 : vector<8x512xi1>, vector<8x512xf32>
    %c40 = arith.constant 40 : index
    %c0_18 = arith.constant 0 : index
    %50 = vector.load %arg9[%c40, %c0_18] : memref<72x512xf32, #tpu.memory_space<vmem>>, vector<8x512xf32>
    tpu.vector_store %arg9[%c40, %c0_18], %49 {strides = array<i32>} : memref<72x512xf32, #tpu.memory_space<vmem>>, vector<8x512xf32>,
    %c1_i32_19 = arith.constant 1 : i32
    %51 = tpu.dynamic_rotate %28 by %c1_i32_19 dim 1 : vector<8x512xf32>, i32 -> vector<8x512xf32>
    %c511_i32_20 = arith.constant 511 : i32
    %52 = tpu.dynamic_rotate %28 by %c511_i32_20 dim 1 : vector<8x512xf32>, i32 -> vector<8x512xf32>
    %53 = vector.shape_cast %8 : vector<1x512xi1> to vector<1x512xi1>
    %54 = vector.broadcast %53 : vector<1x512xi1> to vector<8x512xi1>
    %55 = arith.select %54, %52, %51 : vector<8x512xi1>, vector<8x512xf32>
    %c48 = arith.constant 48 : index
    %c0_21 = arith.constant 0 : index
    %56 = vector.load %arg9[%c48, %c0_21] : memref<72x512xf32, #tpu.memory_space<vmem>>, vector<8x512xf32>
    tpu.vector_store %arg9[%c48, %c0_21], %55 {strides = array<i32>} : memref<72x512xf32, #tpu.memory_space<vmem>>, vector<8x512xf32>,
    %c56 = arith.constant 56 : index
    %c0_22 = arith.constant 0 : index
    %57 = vector.load %arg9[%c56, %c0_22] : memref<72x512xf32, #tpu.memory_space<vmem>>, vector<8x512xf32>
    tpu.vector_store %arg9[%c56, %c0_22], %28 {strides = array<i32>} : memref<72x512xf32, #tpu.memory_space<vmem>>, vector<8x512xf32>,
    %58 = vector.shape_cast %10 : vector<1x512xi1> to vector<1x512xi1>
    %59 = vector.broadcast %58 : vector<1x512xi1> to vector<8x512xi1>
    %60 = arith.select %59, %51, %52 : vector<8x512xi1>, vector<8x512xf32>
    %c64 = arith.constant 64 : index
    %c0_23 = arith.constant 0 : index
    %61 = vector.load %arg9[%c64, %c0_23] : memref<72x512xf32, #tpu.memory_space<vmem>>, vector<8x512xf32>
    tpu.vector_store %arg9[%c64, %c0_23], %60 {strides = array<i32>} : memref<72x512xf32, #tpu.memory_space<vmem>>, vector<8x512xf32>,
    %c0_24 = arith.constant 0 : index
    %c0_25 = arith.constant 0 : index
    %62 = vector.load %arg9[%c0_24, %c0_25] : memref<72x512xf32, #tpu.memory_space<vmem>>, vector<72x512xf32>
    %cst = arith.constant dense<0.000000e+00> : vector<8x512xf32>
    %63 = tpu.matmul %20, %62, %cst {dimension_numbers = #tpu.dot_dimension_numbers<[1], [0], [0], [1], [0, 0, 1, 1], [], []>} : vector<8x72xf32>, vector<72x512xf32>, vector<8x512xf32> -> vector<8x512xf32>
    %c0_26 = arith.constant 0 : index
    %c0_27 = arith.constant 0 : index
    %64 = vector.load %arg3[%c0_26, %c0_27] : memref<8x1xf32, #tpu.memory_space<vmem>>, vector<8x1xf32>
    %c0_28 = arith.constant 0 : index
    %c0_29 = arith.constant 0 : index
    %65 = vector.load %arg4[%c0_28, %c0_29] : memref<8x1xf32, #tpu.memory_space<vmem>>, vector<8x1xf32>
    %66 = vector.extract_strided_slice %63 {offsets = [0, 0], sizes = [8, 256], strides = [1, 1]} : vector<8x512xf32> to vector<8x256xf32>
    %cst_30 = arith.constant dense<0.000000e+00> : vector<8xf32>
    %67 = vector.multi_reduction <add>, %66, %cst_30 [1] : vector<8x256xf32> to vector<8xf32>
    %68 = vector.shape_cast %67 : vector<8xf32> to vector<8x1xf32>
    %cst_31 = arith.constant 3.906250e-03 : f32
    %69 = vector.broadcast %cst_31 : f32 to vector<8x1xf32>
    %70 = arith.mulf %68, %69 : vector<8x1xf32>
    %71 = arith.mulf %66, %66 : vector<8x256xf32>
    %cst_32 = arith.constant dense<0.000000e+00> : vector<8xf32>
    %72 = vector.multi_reduction <add>, %71, %cst_32 [1] : vector<8x256xf32> to vector<8xf32>
    %73 = vector.shape_cast %72 : vector<8xf32> to vector<8x1xf32>
    %cst_33 = arith.constant 3.906250e-03 : f32
    %74 = vector.broadcast %cst_33 : f32 to vector<8x1xf32>
    %75 = arith.mulf %73, %74 : vector<8x1xf32>
    %76 = arith.mulf %70, %70 : vector<8x1xf32>
    %77 = arith.subf %75, %76 : vector<8x1xf32>
    %cst_34 = arith.constant 9.99999974E-6 : f32
    %78 = vector.broadcast %cst_34 : f32 to vector<8x1xf32>
    %79 = arith.addf %77, %78 : vector<8x1xf32>
    %80 = math.rsqrt %79 : vector<8x1xf32>
    %81 = arith.mulf %64, %80 : vector<8x1xf32>
    %82 = arith.mulf %70, %81 : vector<8x1xf32>
    %83 = arith.subf %65, %82 : vector<8x1xf32>
    %84 = vector.broadcast %81 : vector<8x1xf32> to vector<8x256xf32>
    %85 = arith.mulf %66, %84 : vector<8x256xf32>
    %86 = vector.broadcast %83 : vector<8x1xf32> to vector<8x256xf32>
    %87 = arith.addf %85, %86 : vector<8x256xf32>
    %cst_35 = arith.constant 0.000000e+00 : f32
    %88 = vector.broadcast %cst_35 : f32 to vector<8x256xf32>
    %89 = arith.maximumf %87, %88 : vector<8x256xf32>
    %90 = vector.extract_strided_slice %63 {offsets = [0, 256], sizes = [8, 256], strides = [1, 1]} : vector<8x512xf32> to vector<8x256xf32>
    %cst_36 = arith.constant dense<0.000000e+00> : vector<8xf32>
    %91 = vector.multi_reduction <add>, %90, %cst_36 [1] : vector<8x256xf32> to vector<8xf32>
    %92 = vector.shape_cast %91 : vector<8xf32> to vector<8x1xf32>
    %cst_37 = arith.constant 3.906250e-03 : f32
    %93 = vector.broadcast %cst_37 : f32 to vector<8x1xf32>
    %94 = arith.mulf %92, %93 : vector<8x1xf32>
    %95 = arith.mulf %90, %90 : vector<8x256xf32>
    %cst_38 = arith.constant dense<0.000000e+00> : vector<8xf32>
    %96 = vector.multi_reduction <add>, %95, %cst_38 [1] : vector<8x256xf32> to vector<8xf32>
    %97 = vector.shape_cast %96 : vector<8xf32> to vector<8x1xf32>
    %cst_39 = arith.constant 3.906250e-03 : f32
    %98 = vector.broadcast %cst_39 : f32 to vector<8x1xf32>
    %99 = arith.mulf %97, %98 : vector<8x1xf32>
    %100 = arith.mulf %94, %94 : vector<8x1xf32>
    %101 = arith.subf %99, %100 : vector<8x1xf32>
    %cst_40 = arith.constant 9.99999974E-6 : f32
    %102 = vector.broadcast %cst_40 : f32 to vector<8x1xf32>
    %103 = arith.addf %101, %102 : vector<8x1xf32>
    %104 = math.rsqrt %103 : vector<8x1xf32>
    %105 = arith.mulf %64, %104 : vector<8x1xf32>
    %106 = arith.mulf %94, %105 : vector<8x1xf32>
    %107 = arith.subf %65, %106 : vector<8x1xf32>
    %108 = vector.broadcast %105 : vector<8x1xf32> to vector<8x256xf32>
    %109 = arith.mulf %90, %108 : vector<8x256xf32>
    %110 = vector.broadcast %107 : vector<8x1xf32> to vector<8x256xf32>
    %111 = arith.addf %109, %110 : vector<8x256xf32>
    %cst_41 = arith.constant 0.000000e+00 : f32
    %112 = vector.broadcast %cst_41 : f32 to vector<8x256xf32>
    %113 = arith.maximumf %111, %112 : vector<8x256xf32>
    %114 = tpu.concatenate %89, %113 in 1 : vector<8x256xf32>, vector<8x256xf32> -> vector<8x512xf32>
    %c0_42 = arith.constant 0 : index
    %c0_43 = arith.constant 0 : index
    %115 = vector.load %arg5[%c0_42, %c0_43] : memref<8x72xf32, #tpu.memory_space<vmem>>, vector<8x72xf32>
    %c16_i32_44 = arith.constant 16 : i32
    %116 = tpu.dynamic_rotate %114 by %c16_i32_44 dim 1 : vector<8x512xf32>, i32 -> vector<8x512xf32>
    %c496_i32_45 = arith.constant 496 : i32
    %117 = tpu.dynamic_rotate %114 by %c496_i32_45 dim 1 : vector<8x512xf32>, i32 -> vector<8x512xf32>
    %118 = vector.shape_cast %12 : vector<1x512xi1> to vector<1x512xi1>
    %119 = vector.broadcast %118 : vector<1x512xi1> to vector<8x512xi1>
    %120 = arith.select %119, %117, %116 : vector<8x512xi1>, vector<8x512xf32>
    %121 = vector.shape_cast %14 : vector<1x512xi1> to vector<1x512xi1>
    %122 = vector.broadcast %121 : vector<1x512xi1> to vector<8x512xi1>
    %123 = arith.select %122, %116, %117 : vector<8x512xi1>, vector<8x512xf32>
    %c1_i32_46 = arith.constant 1 : i32
    %124 = tpu.dynamic_rotate %120 by %c1_i32_46 dim 1 : vector<8x512xf32>, i32 -> vector<8x512xf32>
    %c511_i32_47 = arith.constant 511 : i32
    %125 = tpu.dynamic_rotate %120 by %c511_i32_47 dim 1 : vector<8x512xf32>, i32 -> vector<8x512xf32>
    %126 = vector.shape_cast %8 : vector<1x512xi1> to vector<1x512xi1>
    %127 = vector.broadcast %126 : vector<1x512xi1> to vector<8x512xi1>
    %128 = arith.select %127, %125, %124 : vector<8x512xi1>, vector<8x512xf32>
    %c0_48 = arith.constant 0 : index
    %c0_49 = arith.constant 0 : index
    %129 = vector.load %arg9[%c0_48, %c0_49] : memref<72x512xf32, #tpu.memory_space<vmem>>, vector<8x512xf32>
    tpu.vector_store %arg9[%c0_48, %c0_49], %128 {strides = array<i32>} : memref<72x512xf32, #tpu.memory_space<vmem>>, vector<8x512xf32>,
    %c8_50 = arith.constant 8 : index
    %c0_51 = arith.constant 0 : index
    %130 = vector.load %arg9[%c8_50, %c0_51] : memref<72x512xf32, #tpu.memory_space<vmem>>, vector<8x512xf32>
    tpu.vector_store %arg9[%c8_50, %c0_51], %120 {strides = array<i32>} : memref<72x512xf32, #tpu.memory_space<vmem>>, vector<8x512xf32>,
    %131 = vector.shape_cast %10 : vector<1x512xi1> to vector<1x512xi1>
    %132 = vector.broadcast %131 : vector<1x512xi1> to vector<8x512xi1>
    %133 = arith.select %132, %124, %125 : vector<8x512xi1>, vector<8x512xf32>
    %c16_52 = arith.constant 16 : index
    %c0_53 = arith.constant 0 : index
    %134 = vector.load %arg9[%c16_52, %c0_53] : memref<72x512xf32, #tpu.memory_space<vmem>>, vector<8x512xf32>
    tpu.vector_store %arg9[%c16_52, %c0_53], %133 {strides = array<i32>} : memref<72x512xf32, #tpu.memory_space<vmem>>, vector<8x512xf32>,
    %c1_i32_54 = arith.constant 1 : i32
    %135 = tpu.dynamic_rotate %114 by %c1_i32_54 dim 1 : vector<8x512xf32>, i32 -> vector<8x512xf32>
    %c511_i32_55 = arith.constant 511 : i32
    %136 = tpu.dynamic_rotate %114 by %c511_i32_55 dim 1 : vector<8x512xf32>, i32 -> vector<8x512xf32>
    %137 = vector.shape_cast %8 : vector<1x512xi1> to vector<1x512xi1>
    %138 = vector.broadcast %137 : vector<1x512xi1> to vector<8x512xi1>
    %139 = arith.select %138, %136, %135 : vector<8x512xi1>, vector<8x512xf32>
    %c24_56 = arith.constant 24 : index
    %c0_57 = arith.constant 0 : index
    %140 = vector.load %arg9[%c24_56, %c0_57] : memref<72x512xf32, #tpu.memory_space<vmem>>, vector<8x512xf32>
    tpu.vector_store %arg9[%c24_56, %c0_57], %139 {strides = array<i32>} : memref<72x512xf32, #tpu.memory_space<vmem>>, vector<8x512xf32>,
    %c32_58 = arith.constant 32 : index
    %c0_59 = arith.constant 0 : index
    %141 = vector.load %arg9[%c32_58, %c0_59] : memref<72x512xf32, #tpu.memory_space<vmem>>, vector<8x512xf32>
    tpu.vector_store %arg9[%c32_58, %c0_59], %114 {strides = array<i32>} : memref<72x512xf32, #tpu.memory_space<vmem>>, vector<8x512xf32>,
    %142 = vector.shape_cast %10 : vector<1x512xi1> to vector<1x512xi1>
    %143 = vector.broadcast %142 : vector<1x512xi1> to vector<8x512xi1>
    %144 = arith.select %143, %135, %136 : vector<8x512xi1>, vector<8x512xf32>
    %c40_60 = arith.constant 40 : index
    %c0_61 = arith.constant 0 : index
    %145 = vector.load %arg9[%c40_60, %c0_61] : memref<72x512xf32, #tpu.memory_space<vmem>>, vector<8x512xf32>
    tpu.vector_store %arg9[%c40_60, %c0_61], %144 {strides = array<i32>} : memref<72x512xf32, #tpu.memory_space<vmem>>, vector<8x512xf32>,
    %c1_i32_62 = arith.constant 1 : i32
    %146 = tpu.dynamic_rotate %123 by %c1_i32_62 dim 1 : vector<8x512xf32>, i32 -> vector<8x512xf32>
    %c511_i32_63 = arith.constant 511 : i32
    %147 = tpu.dynamic_rotate %123 by %c511_i32_63 dim 1 : vector<8x512xf32>, i32 -> vector<8x512xf32>
    %148 = vector.shape_cast %8 : vector<1x512xi1> to vector<1x512xi1>
    %149 = vector.broadcast %148 : vector<1x512xi1> to vector<8x512xi1>
    %150 = arith.select %149, %147, %146 : vector<8x512xi1>, vector<8x512xf32>
    %c48_64 = arith.constant 48 : index
    %c0_65 = arith.constant 0 : index
    %151 = vector.load %arg9[%c48_64, %c0_65] : memref<72x512xf32, #tpu.memory_space<vmem>>, vector<8x512xf32>
    tpu.vector_store %arg9[%c48_64, %c0_65], %150 {strides = array<i32>} : memref<72x512xf32, #tpu.memory_space<vmem>>, vector<8x512xf32>,
    %c56_66 = arith.constant 56 : index
    %c0_67 = arith.constant 0 : index
    %152 = vector.load %arg9[%c56_66, %c0_67] : memref<72x512xf32, #tpu.memory_space<vmem>>, vector<8x512xf32>
    tpu.vector_store %arg9[%c56_66, %c0_67], %123 {strides = array<i32>} : memref<72x512xf32, #tpu.memory_space<vmem>>, vector<8x512xf32>,
    %153 = vector.shape_cast %10 : vector<1x512xi1> to vector<1x512xi1>
    %154 = vector.broadcast %153 : vector<1x512xi1> to vector<8x512xi1>
    %155 = arith.select %154, %146, %147 : vector<8x512xi1>, vector<8x512xf32>
    %c64_68 = arith.constant 64 : index
    %c0_69 = arith.constant 0 : index
    %156 = vector.load %arg9[%c64_68, %c0_69] : memref<72x512xf32, #tpu.memory_space<vmem>>, vector<8x512xf32>
    tpu.vector_store %arg9[%c64_68, %c0_69], %155 {strides = array<i32>} : memref<72x512xf32, #tpu.memory_space<vmem>>, vector<8x512xf32>,
    %c0_70 = arith.constant 0 : index
    %c0_71 = arith.constant 0 : index
    %157 = vector.load %arg9[%c0_70, %c0_71] : memref<72x512xf32, #tpu.memory_space<vmem>>, vector<72x512xf32>
    %cst_72 = arith.constant dense<0.000000e+00> : vector<8x512xf32>
    %158 = tpu.matmul %115, %157, %cst_72 {dimension_numbers = #tpu.dot_dimension_numbers<[1], [0], [0], [1], [0, 0, 1, 1], [], []>} : vector<8x72xf32>, vector<72x512xf32>, vector<8x512xf32> -> vector<8x512xf32>
    %c0_73 = arith.constant 0 : index
    %c0_74 = arith.constant 0 : index
    %159 = vector.load %arg6[%c0_73, %c0_74] : memref<8x1xf32, #tpu.memory_space<vmem>>, vector<8x1xf32>
    %c0_75 = arith.constant 0 : index
    %c0_76 = arith.constant 0 : index
    %160 = vector.load %arg7[%c0_75, %c0_76] : memref<8x1xf32, #tpu.memory_space<vmem>>, vector<8x1xf32>
    %161 = vector.extract_strided_slice %158 {offsets = [0, 0], sizes = [8, 256], strides = [1, 1]} : vector<8x512xf32> to vector<8x256xf32>
    %162 = vector.extract_strided_slice %19 {offsets = [0, 0], sizes = [8, 256], strides = [1, 1]} : vector<8x512xf32> to vector<8x256xf32>
    %cst_77 = arith.constant dense<0.000000e+00> : vector<8xf32>
    %163 = vector.multi_reduction <add>, %161, %cst_77 [1] : vector<8x256xf32> to vector<8xf32>
    %164 = vector.shape_cast %163 : vector<8xf32> to vector<8x1xf32>
    %cst_78 = arith.constant 3.906250e-03 : f32
    %165 = vector.broadcast %cst_78 : f32 to vector<8x1xf32>
    %166 = arith.mulf %164, %165 : vector<8x1xf32>
    %167 = arith.mulf %161, %161 : vector<8x256xf32>
    %cst_79 = arith.constant dense<0.000000e+00> : vector<8xf32>
    %168 = vector.multi_reduction <add>, %167, %cst_79 [1] : vector<8x256xf32> to vector<8xf32>
    %169 = vector.shape_cast %168 : vector<8xf32> to vector<8x1xf32>
    %cst_80 = arith.constant 3.906250e-03 : f32
    %170 = vector.broadcast %cst_80 : f32 to vector<8x1xf32>
    %171 = arith.mulf %169, %170 : vector<8x1xf32>
    %172 = arith.mulf %166, %166 : vector<8x1xf32>
    %173 = arith.subf %171, %172 : vector<8x1xf32>
    %cst_81 = arith.constant 9.99999974E-6 : f32
    %174 = vector.broadcast %cst_81 : f32 to vector<8x1xf32>
    %175 = arith.addf %173, %174 : vector<8x1xf32>
    %176 = math.rsqrt %175 : vector<8x1xf32>
    %177 = arith.mulf %159, %176 : vector<8x1xf32>
    %178 = arith.mulf %166, %177 : vector<8x1xf32>
    %179 = arith.subf %160, %178 : vector<8x1xf32>
    %180 = vector.broadcast %177 : vector<8x1xf32> to vector<8x256xf32>
    %181 = arith.mulf %161, %180 : vector<8x256xf32>
    %182 = vector.broadcast %179 : vector<8x1xf32> to vector<8x256xf32>
    %183 = arith.addf %181, %182 : vector<8x256xf32>
    %184 = arith.addf %183, %162 : vector<8x256xf32>
    %c0_82 = arith.constant 0 : index
    %c0_83 = arith.constant 0 : index
    %c0_84 = arith.constant 0 : index
    %185 = vector.load %arg8[%c0_82, %c0_83, %c0_84] : memref<2x8x256xf32, #tpu.memory_space<vmem>>, vector<1x8x256xf32>
    %186 = vector.shape_cast %185 : vector<1x8x256xf32> to vector<8x256xf32>
    %187 = vector.shape_cast %184 : vector<8x256xf32> to vector<1x8x256xf32>
    tpu.vector_store %arg8[%c0_82, %c0_83, %c0_84], %187 {strides = array<i32>} : memref<2x8x256xf32, #tpu.memory_space<vmem>>, vector<1x8x256xf32>,
    %188 = vector.extract_strided_slice %158 {offsets = [0, 256], sizes = [8, 256], strides = [1, 1]} : vector<8x512xf32> to vector<8x256xf32>
    %189 = vector.extract_strided_slice %19 {offsets = [0, 256], sizes = [8, 256], strides = [1, 1]} : vector<8x512xf32> to vector<8x256xf32>
    %cst_85 = arith.constant dense<0.000000e+00> : vector<8xf32>
    %190 = vector.multi_reduction <add>, %188, %cst_85 [1] : vector<8x256xf32> to vector<8xf32>
    %191 = vector.shape_cast %190 : vector<8xf32> to vector<8x1xf32>
    %cst_86 = arith.constant 3.906250e-03 : f32
    %192 = vector.broadcast %cst_86 : f32 to vector<8x1xf32>
    %193 = arith.mulf %191, %192 : vector<8x1xf32>
    %194 = arith.mulf %188, %188 : vector<8x256xf32>
    %cst_87 = arith.constant dense<0.000000e+00> : vector<8xf32>
    %195 = vector.multi_reduction <add>, %194, %cst_87 [1] : vector<8x256xf32> to vector<8xf32>
    %196 = vector.shape_cast %195 : vector<8xf32> to vector<8x1xf32>
    %cst_88 = arith.constant 3.906250e-03 : f32
    %197 = vector.broadcast %cst_88 : f32 to vector<8x1xf32>
    %198 = arith.mulf %196, %197 : vector<8x1xf32>
    %199 = arith.mulf %193, %193 : vector<8x1xf32>
    %200 = arith.subf %198, %199 : vector<8x1xf32>
    %cst_89 = arith.constant 9.99999974E-6 : f32
    %201 = vector.broadcast %cst_89 : f32 to vector<8x1xf32>
    %202 = arith.addf %200, %201 : vector<8x1xf32>
    %203 = math.rsqrt %202 : vector<8x1xf32>
    %204 = arith.mulf %159, %203 : vector<8x1xf32>
    %205 = arith.mulf %193, %204 : vector<8x1xf32>
    %206 = arith.subf %160, %205 : vector<8x1xf32>
    %207 = vector.broadcast %204 : vector<8x1xf32> to vector<8x256xf32>
    %208 = arith.mulf %188, %207 : vector<8x256xf32>
    %209 = vector.broadcast %206 : vector<8x1xf32> to vector<8x256xf32>
    %210 = arith.addf %208, %209 : vector<8x256xf32>
    %211 = arith.addf %210, %189 : vector<8x256xf32>
    %c1_90 = arith.constant 1 : index
    %c0_91 = arith.constant 0 : index
    %c0_92 = arith.constant 0 : index
    %212 = vector.load %arg8[%c1_90, %c0_91, %c0_92] : memref<2x8x256xf32, #tpu.memory_space<vmem>>, vector<1x8x256xf32>
    %213 = vector.shape_cast %212 : vector<1x8x256xf32> to vector<8x256xf32>
    %214 = vector.shape_cast %211 : vector<8x256xf32> to vector<1x8x256xf32>
    tpu.vector_store %arg8[%c1_90, %c0_91, %c0_92], %214 {strides = array<i32>} : memref<2x8x256xf32, #tpu.memory_space<vmem>>, vector<1x8x256xf32>,
    return
  }
  func.func @transform_0(%arg0: i32) -> (i32, i32, i32) {
    %c0_i32 = arith.constant 0 : i32
    %c0_i32_0 = arith.constant 0 : i32
    %c0_i32_1 = arith.constant 0 : i32
    return %arg0, %c0_i32, %c0_i32_0 : i32, i32, i32
  }
  func.func @transform_1(%arg0: i32) -> (i32, i32) {
    %c0_i32 = arith.constant 0 : i32
    %c0_i32_0 = arith.constant 0 : i32
    %c0_i32_1 = arith.constant 0 : i32
    return %c0_i32, %c0_i32_0 : i32, i32
  }
  func.func @transform_2(%arg0: i32) -> (i32, i32) {
    %c0_i32 = arith.constant 0 : i32
    %c0_i32_0 = arith.constant 0 : i32
    %c0_i32_1 = arith.constant 0 : i32
    return %c0_i32, %c0_i32_0 : i32, i32
  }
  func.func @transform_3(%arg0: i32) -> (i32, i32) {
    %c0_i32 = arith.constant 0 : i32
    %c0_i32_0 = arith.constant 0 : i32
    %c0_i32_1 = arith.constant 0 : i32
    return %c0_i32, %c0_i32_0 : i32, i32
  }
  func.func @transform_4(%arg0: i32) -> (i32, i32) {
    %c0_i32 = arith.constant 0 : i32
    %c0_i32_0 = arith.constant 0 : i32
    %c0_i32_1 = arith.constant 0 : i32
    return %c0_i32, %c0_i32_0 : i32, i32
  }
  func.func @transform_5(%arg0: i32) -> (i32, i32) {
    %c0_i32 = arith.constant 0 : i32
    %c0_i32_0 = arith.constant 0 : i32
    %c0_i32_1 = arith.constant 0 : i32
    return %c0_i32, %c0_i32_0 : i32, i32
  }
  func.func @transform_6(%arg0: i32) -> (i32, i32) {
    %c0_i32 = arith.constant 0 : i32
    %c0_i32_0 = arith.constant 0 : i32
    %c0_i32_1 = arith.constant 0 : i32
    return %c0_i32, %c0_i32_0 : i32, i32
  }
  func.func @transform_7(%arg0: i32) -> (i32, i32, i32) {
    %c0_i32 = arith.constant 0 : i32
    %c0_i32_0 = arith.constant 0 : i32
    %c0_i32_1 = arith.constant 0 : i32
    return %arg0, %c0_i32, %c0_i32_0 : i32, i32, i32
  }
}

</mosaic_0001>

<bundles_post_ra>
// kernel: tpu_custom_call.1
= control target key start
LH: loop header
LB: loop body
LE: loop exit
PB: predicated region body
PF: predicated region fallthrough
CT: control target
= control target key end

     0   :  { %12 = vsyncpa [#allocation4], 0  ;;  %s2408_s0 = inlined_call_operand.hbm [shape: f32[4,8,256], index: 0, kind: input, shape index: {}]   ;;  %s2409_s1 = inlined_call_operand.vmem [shape: f32[8,72], index: 1, kind: input, shape index: {}]   ;;  %s2410_s2 = inlined_call_operand.vmem [shape: f32[8,1], index: 2, kind: input, shape index: {}]   ;;  %s2411_s3 = inlined_call_operand.vmem [shape: f32[8,1], index: 3, kind: input, shape index: {}]   ;;  %s2412_s4 = inlined_call_operand.vmem [shape: f32[8,72], index: 4, kind: input, shape index: {}]   ;;  %s2413_s5 = inlined_call_operand.vmem [shape: f32[8,1], index: 5, kind: input, shape index: {}]   ;;  %s2414_s6 = inlined_call_operand.vmem [shape: f32[8,1], index: 6, kind: input, shape index: {}]   ;;  %s2415_s7 = inlined_call_operand.hbm [shape: f32[4,8,256], index: 7, kind: output, shape index: {}]  }
   0x1   :  { %14 = vsyncpa [#allocation4 + $0x1], 0 }
   0x2   :  { %15 = vsyncpa [#allocation5], 0 }
   0x3   :  { %17 = vsyncpa [#allocation5 + $0x1], 0  ;;  %s1686_s24 = smov 0   ;;  %s1688_s25 = smov 0  }
   0x4   :  { %s1690_s26 = smov 0   ;;  %s1692_s27 = smov 0  }
   0x5 LB: > { %s1707_s28 = sadd.s32 4294967295, %s1633_s27   ;;  %s1296_s29 = sadd.s32 4294967294, %s1633_s27   ;;  %s1633_s27 = sphi %s1692_s27, %s2464_s27   ;;  %s1629_s26 = sphi %s1690_s26, %s2463_s26   ;;  %s1625_s25 = sphi %s1688_s25, %s2462_s25   ;;  %s1621_s24 = sphi %s1686_s24, %s2461_s24  }
   0x6   : > { %s1711_s30 = sadd.s32 1, %s1633_s27   ;;  %s30_s8 = sadd.s32 1, %s1629_s26 }
   0x7   : > { %s27_s9 = ssub.s32 %s1633_s27, %s1711_s30  ;;  %p37_p0 = scmp.ne.s32.totalorder %s1629_s26, %s1625_s25 }
   0x8   : > { %p28_p1 = scmp.eq.s32.totalorder %s27_s9, 0  ;;  %p38_p2 = scmp.eq.s32.totalorder %s1633_s27, 0 }
   0x9   : > { %p43_p3 = scmp.ne.s32.totalorder %s1625_s25, %s1621_s24  ;;  %p44_p4 = scmp.eq.s32.totalorder %s1707_s28, 0 }
   0xa   : > { %s1723_s10 = scalar_select %p28_p1, %s1629_s26, %s30_s8  }
   0xb   : > { %p1725_p5 = por %p38_p2, %p37_p0  ;;  %p1729_p6 = por %p44_p4, %p43_p3 }
   0xc   : > { %p193_p7 = scmp.eq.s32.totalorder %s1707_s28, 1  ;;  %p199_p8 = scmp.eq.s32.totalorder %s1296_s29, 1 }
   0xd   : > { %p1400_p10 = scmp.lt.s32.totalorder %s1633_s27, 2  ;;  %s237_s15 = sand.u32 1, %s1629_s26  }
   0xe   : > { %p1736_p11 = por %p193_p7, %p37_p0  ;;  %p1740_p12 = por %p199_p8, %p43_p3 }
   0xf   : > { %s1321_s16 = sshll.u32 %s1633_s27, 9  ;;  %s1299_s17 = sshll.u32 %s237_s15, 5 }
  0x10   : > { %s2424_s13 = scalar_select %p1736_p11, 1, 0 }
  0x11   : > { %s2425_s14 = scalar_select %p1740_p12, 1, 0 }
  0x12   : > { %s1749_s20 = scalar_lea.hbm %s2408_s0, %s1321_s16  ;;  %s241_s21 = scalar_lea.vmem [#allocation3], %s1299_s17 }
  0x13   : > { %s249_s22 = sshll.u32 %s241_s21, 4  ;;  %p1753_p13 = pnand %p1400_p10, %p1725_p5  ;;  %s1757_s22 = int_to_ptr.vmem [resolvable:$true] %s249_s22 }
  0x14   : > { %s1759_s29 = scalar_lea.sflag [#allocation4], %s237_s15  ;;  %s1537_s8 = scalar_lea.hbm %s1749_s20, 512 }
  0x15   : > { %p1538_p0 = scmp.ne.s32.totalorder %s1749_s20, %s1537_s8  ;;  %p1539_p1 = pneg %p1753_p13 }
  0x16   : > { %s1542_s16 = scalar_lea.hbm %s2408_s0, 1024  ;;  %p1543_p4 = scmp.lt.u32.totalorder %s1749_s20, %s2408_s0 }
  0x17   : > { %p1540_p2 = pnand %p1539_p1, %p1538_p0  ;;  %p1544_p5 = scmp.lt.u32.totalorder %s1542_s16, %s1537_s8 }
  0x18   : > { %p1546_p8 = scmp.lt.u32.totalorder %s1537_s8, %s1749_s20 }
  0x19   : > { %p1541_p3 = pneg %p1540_p2  ;;  %p1545_p7 = por %p1544_p5, %p1543_p4 }
  0x1b   : > { %p1547_p10 = por %p1546_p8, %p1545_p7 }
  0x1d   : > { %p1548_p9 = pnand %p1547_p10, %p1541_p3 }
  0x1f   : > { %1551 = shalt.err (!%p1548_p9)
}
  0x20   : > { %s1552_s15 = scalar_lea.vmem %s1757_s22, 512  ;;  %s1635_s19 = smov [#allocation3]  }
  0x21   : > { %p1553_p0 = scmp.ne.s32.totalorder %s1757_s22, %s1552_s15  ;;  %s1557_s21 = sshll.u32 %s1635_s19, 4  ;;  %s1558_s21 = int_to_ptr.vmem [resolvable:$false] %s1557_s21 }
  0x22   : > { %s1559_s9 = scalar_lea.vmem %s1558_s21, 1024  ;;  %p1560_p11 = scmp.lt.s32.totalorder %s1757_s22, %s1558_s21 }
  0x23   : > { %p1555_p2 = pnand %p1553_p0, %p1539_p1  ;;  %p1561_p4 = scmp.lt.s32.totalorder %s1559_s9, %s1552_s15 }
  0x25   : > { %p1556_p12 = pneg %p1555_p2  ;;  %p1562_p5 = por %p1561_p4, %p1560_p11 }
  0x27   : > { %p1563_p7 = pnand %p1562_p5, %p1556_p12 }
  0x29   : > { %1566 = shalt.err (!%p1563_p7)
}
  0x2a   : > { %s1636_s8 = smov 256   ;;  %s1637_s11 = smov 16  }
  0x2b   : > { %1395 = dma.hbm_to_vmem [thread:$0]  (!%p1753_p13), %s1749_s20, 512, %s1757_s22, %s1759_s29, %s1636_s8, %s1636_s8, %s1637_s11  }
  0x2c   : > { %p1303_p9 = scmp.ge.s32.totalorder %s1633_s27, 1  ;;  %p257_p1 = scmp.lt.s32.totalorder %s1633_s27, 3 }
  0x2e   : > { %p258_p3 = pnand %p1303_p9, %p257_p1 }
  0x2f   : > { %s1790_s16 = sand.u32 (!%p258_p3), 1, %s1625_s25  }
  0x30   : > { %261 = sbr.rel (%p258_p3) target bundleno = 1670 (0x686), region = 48  ;;  %s1304_s17 = sshll.u32 (!%p258_p3), %s1790_s16, 5 }
  0x31   : > { %s264_s18 = scalar_lea.sflag (!%p258_p3), [#allocation4], %s1790_s16  ;;  %s1796_s15 = scalar_lea.vmem (!%p258_p3), [#allocation3], %s1304_s17 }
  0x37   : > { %1612 = dma.done.wait (%p1729_p6), %s264_s18, 512  }
  0x38   : > { %1614 = vsyncadd (%p1729_p6), %s264_s18, 4294966784  ;;  %v1803_v0 = vld [vmem:[%s1796_s15 + $0x10] sm:$0xff]  ;;  %v1806_v1 = vld [vmem:[%s1796_s15] sm:$0xff]  ;;  %s1638_s20 = smov 16   ;;  %s1639_s12 = smov 112   ;;  %v300_v6 = vlaneseq  ;;  %v1642_v45 = vmov 0.0  }
  0x39   : > { %343 = vrot.lane.b32.xlu1 %v1803_v0, %s1638_s20  ;;  %339 = vrot.lane.b32.xlu0 %v1806_v1, %s1638_s20  ;;  %v1813_v2 = vld [vmem:[%s1796_s15 + $0x18] sm:$0xff]  ;;  %v1816_v3 = vld [vmem:[%s1796_s15 + $0x8] sm:$0xff]  ;;  %s1640_s22 = smov 1   ;;  %s1641_s23 = smov 127  }
  0x3a   : > { %v1448_v4 = vpack.i.bf16 %v1813_v2, %v1803_v0  ;;  %v1443_v5 = vpack.i.bf16 %v1816_v3, %v1806_v1  ;;  %v1838_v7 = vand.u32 127, %v300_v6  ;;  %643 = vmatprep.mubr.f32.mxu0 %v1642_v45  ;;  %714 = vmatprep.mubr.f32.mxu1 %v1642_v45  ;;  %s297_s21 = scalar_lea.vmem [#allocation6], %s1304_s17  ;;  %s1323_s8 = sshll.u32 %s1707_s28, 9 }
  0x3b   : > { %s1223_s9 = sshll.u32 %s297_s21, 4  ;;  %s2363_s18 = scalar_lea.hbm %s2415_s7, %s1323_s8  ;;  %s2356_s9 = int_to_ptr.vmem [resolvable:$true] %s1223_s9 }
  0x3c   : > { %v1841_v8 = vadd.s32 384, %v1838_v7  ;;  %v1844_v9 = vadd.s32 128, %v1838_v7  ;;  %v1847_v10 = vadd.s32 256, %v1838_v7  ;;  %v309_v13 = vshra.s32 %v1838_v7, 4  ;;  %s1209_s28 = scalar_lea.sflag [#allocation5], %s1790_s16  ;;  %p2458_p11 = scmp.ne.s32.totalorder %s2424_s13, 0 }
  0x3d   : > { %345 = vrot.lane.b32.xlu1 %v1813_v2, %s1638_s20  ;;  %341 = vrot.lane.b32.xlu0 %v1816_v3, %s1638_s20  ;;  %vm360_vm0 = vcmp.lt.s32.totalorder %v1838_v7, 112  ;;  %vm347_vm1 = vcmp.lt.s32.totalorder %v1838_v7, 16  ;;  %v305_v49 = vand.u32 15, %v1838_v7  ;;  %vm397_vm10 = vcmp.lt.s32.totalorder %v1838_v7, 1 }
  0x3e   : > { %v312_v14 = vshra.s32 %v1841_v8, 4  ;;  %v310_v15 = vshra.s32 %v1844_v9, 4  ;;  %v311_v16 = vshra.s32 %v1847_v10, 4  ;;  %v1853_v19 = vand.u32 15, %v309_v13 }
  0x3f   : > { %v306_v48 = vand.u32 15, %v1844_v9  ;;  %v307_v52 = vand.u32 15, %v1847_v10  ;;  %v308_v53 = vand.u32 15, %v1841_v8  ;;  %vm2421_vm11 = vcmp.lt.s32.totalorder %v1838_v7, 127  ;;  %v789_v8 = vld [vmem:[%s2412_s4] sm:$0xff] }
  0x40   : > { %v1855_v20 = vand.u32 15, %v312_v14  ;;  %v1857_v21 = vand.u32 15, %v310_v15  ;;  %v1859_v22 = vand.u32 15, %v311_v16  ;;  %vm325_vm2 = vcmp.eq.s32.totalorder %v1853_v19, 0 }
  0x41   : > { %354 = vrot.lane.b32.xlu1 %v1816_v3, %s1639_s12  ;;  %352 = vrot.lane.b32.xlu0 %v1806_v1, %s1639_s12  ;;  %vm2420_vm6 = vcmp.eq.s32.totalorder %v1853_v19, 15  ;;  %vm1951_vm12 = vcmp.eq.s32.totalorder %v306_v48, 0  ;;  %vm1955_vm13 = vcmp.eq.s32.totalorder %v305_v49, 0  ;;  %vm1959_vm14 = vcmp.eq.s32.totalorder %v308_v53, 0 }
  0x42   : > { %vm328_vm3 = vcmp.eq.s32.totalorder %v1855_v20, 0  ;;  %vm326_vm4 = vcmp.eq.s32.totalorder %v1857_v21, 0  ;;  %vm327_vm5 = vcmp.eq.s32.totalorder %v1859_v22, 0  ;;  %vm2418_vm7 = vcmp.eq.s32.totalorder %v1857_v21, 15 }
  0x43   : > { %vm2419_vm8 = vcmp.eq.s32.totalorder %v1859_v22, 15  ;;  %vm2417_vm9 = vcmp.eq.s32.totalorder %v1855_v20, 15  ;;  %vm1965_vm15 = vcmp.eq.s32.totalorder %v307_v52, 0 }
  0x45   : > { %358 = vrot.lane.b32.xlu1 %v1813_v2, %s1639_s12  ;;  %356 = vrot.lane.b32.xlu0 %v1803_v0, %s1639_s12 }
  0x49   : > { %1449 = vrot.lane.b32.xlu1 %v1448_v4, %s1640_s22  ;;  %1444 = vrot.lane.b32.xlu0 %v1443_v5, %s1640_s22 }
  0x4d   : > { %1459 = vrot.lane.b32.xlu1 %v1448_v4, %s1641_s23  ;;  %1454 = vrot.lane.b32.xlu0 %v1443_v5, %s1641_s23 }
  0xab   : > { %v344_v11 = vpop.permute.xlu1 %343  ;;  %v340_v12 = vpop.permute.xlu0 %339 }
  0xaf   : > { %v346_v17 = vpop.permute.xlu1 %345  ;;  %v342_v18 = vpop.permute.xlu0 %341 }
  0xb0   : > { %v348_v26 = vsel %vm347_vm1, %v344_v11, %v346_v17  ;;  %v351_v27 = vsel %vm347_vm1, %v346_v17, %v340_v12  ;;  %v349_v28 = vsel %vm347_vm1, %v342_v18, %v344_v11  ;;  %v350_v31 = vsel %vm347_vm1, %v340_v12, %v342_v18 }
  0xb3   : > { %v355_v23 = vpop.permute.xlu1 %354  ;;  %v353_v24 = vpop.permute.xlu0 %352 }
  0xb4   : > { %v363_v25 = vsel %vm360_vm0, %v353_v24, %v355_v23 }
  0xb5   : > { %v1885_v35 = vsel %vm325_vm2, %v363_v25, %v351_v27  ;;  %v1911_v41 = vsel %vm2420_vm6, %v351_v27, %v363_v25  ;;  %vm2043_vm6 = vcmp.eq.s32.totalorder %v307_v52, 15 }
  0xb7   : > { %v359_v29 = vpop.permute.xlu1 %358  ;;  %v357_v30 = vpop.permute.xlu0 %356 }
  0xb8   : > { %v364_v32 = vsel %vm360_vm0, %v359_v29, %v353_v24  ;;  %v361_v33 = vsel %vm360_vm0, %v357_v30, %v359_v29  ;;  %v362_v34 = vsel %vm360_vm0, %v355_v23, %v357_v30 }
  0xb9   : > { %v1889_v36 = vsel %vm328_vm3, %v364_v32, %v348_v26  ;;  %v1893_v37 = vsel %vm326_vm4, %v362_v34, %v350_v31  ;;  %v1897_v38 = vsel %vm327_vm5, %v361_v33, %v349_v28  ;;  %v1915_v42 = vsel %vm2418_vm7, %v350_v31, %v362_v34 }
  0xba   : > { %v1463_v39 = vpack.i.bf16 %v1893_v37, %v1885_v35  ;;  %v1468_v40 = vpack.i.bf16 %v1889_v36, %v1897_v38  ;;  %v1925_v43 = vsel %vm2419_vm8, %v349_v28, %v361_v33  ;;  %v1929_v44 = vsel %vm2417_vm9, %v348_v26, %v364_v32 }
  0xbb   : > { %v1450_v46 = vpop.permute.xlu1 %1449  ;;  %v1445_v47 = vpop.permute.xlu0 %1444  ;;  %vm1969_vm9 = vcmp.eq.s32.totalorder %v306_v48, 15  ;;  %vm1973_vm7 = vcmp.eq.s32.totalorder %v308_v53, 15  ;;  %vm1977_vm8 = vcmp.eq.s32.totalorder %v305_v49, 15 }
  0xbc   : > { %1464 = vrot.lane.b32.xlu0 %v1463_v39, %s1640_s22  ;;  %1469 = vrot.lane.b32.xlu1 %v1468_v40, %s1640_s22  ;;  %v1452_v55 = vunpack.i.h.bf16 %v1450_v46  ;;  %v1451_v56 = vunpack.i.l.bf16 %v1450_v46  ;;  %v1447_v57 = vunpack.i.h.bf16 %v1445_v47  ;;  %v1446_v58 = vunpack.i.l.bf16 %v1445_v47 }
  0xbe   : > { %v459_v17 = vsel %vm397_vm10, %v1451_v56, %v1452_v55  ;;  %v1985_v18 = vsel %vm397_vm10, %v1447_v57, %v1451_v56  ;;  %v461_v23 = vsel %vm397_vm10, %v1446_v58, %v1447_v57  ;;  %v1991_v24 = vsel %vm397_vm10, %v1452_v55, %v1446_v58 }
  0xbf   : > { %v1460_v50 = vpop.permute.xlu1 %1459  ;;  %v1455_v51 = vpop.permute.xlu0 %1454 }
  0xc0   : > { %1474 = vrot.lane.b32.xlu0 %v1463_v39, %s1641_s23  ;;  %1479 = vrot.lane.b32.xlu1 %v1468_v40, %s1641_s23  ;;  %v1462_v60 = vunpack.i.h.bf16 %v1460_v50  ;;  %v1461_v61 = vunpack.i.l.bf16 %v1460_v50  ;;  %v1457_v62 = vunpack.i.h.bf16 %v1455_v51  ;;  %v1456_v63 = vunpack.i.l.bf16 %v1455_v51 }
  0xc2   : > { %v1995_v25 = vsel %vm2421_vm11, %v1461_v61, %v1462_v60  ;;  %v472_v26 = vsel %vm2421_vm11, %v1457_v62, %v1461_v61  ;;  %v473_v27 = vsel %vm2421_vm11, %v1456_v63, %v1457_v62  ;;  %v474_v28 = vsel %vm2421_vm11, %v1462_v60, %v1456_v63 }
  0xc3   : > { %v475_v10 = vsel %vm1955_vm13, %v473_v27, %v1991_v24  ;;  %v477_v52 = vsel %vm1965_vm15, %v1995_v25, %v1985_v18 }
  0xc4   : > { %495 = vrot.lane.b32.xlu0 %v1911_v41, %s1640_s22  ;;  %497 = vrot.lane.b32.xlu1 %v1915_v42, %s1640_s22 }
  0xc8   : > { %499 = vrot.lane.b32.xlu0 %v1925_v43, %s1640_s22  ;;  %501 = vrot.lane.b32.xlu1 %v1929_v44, %s1640_s22 }
  0xcc   : > { %507 = vrot.lane.b32.xlu0 %v1911_v41, %s1641_s23  ;;  %509 = vrot.lane.b32.xlu1 %v1915_v42, %s1641_s23 }
  0xd0   : > { %511 = vrot.lane.b32.xlu0 %v1925_v43, %s1641_s23  ;;  %513 = vrot.lane.b32.xlu1 %v1929_v44, %s1641_s23 }
 0x12e   : > { %v1470_v4 = vpop.permute.xlu1 %1469  ;;  %v1465_v5 = vpop.permute.xlu0 %1464 }
 0x12f   : > { %v1472_v12 = vunpack.i.h.bf16 %v1470_v4  ;;  %v1471_v13 = vunpack.i.l.bf16 %v1470_v4  ;;  %v1467_v14 = vunpack.i.h.bf16 %v1465_v5  ;;  %v1466_v15 = vunpack.i.l.bf16 %v1465_v5 }
 0x130   : > { %v476_v4 = vsel %vm1951_vm12, %v472_v26, %v461_v23 }
 0x131   : > { %v400_v39 = vsel %vm397_vm10, %v1466_v15, %v1467_v14  ;;  %v398_v40 = vsel %vm397_vm10, %v1471_v13, %v1472_v12  ;;  %v401_v46 = vsel %vm397_vm10, %v1472_v12, %v1466_v15  ;;  %v399_v47 = vsel %vm397_vm10, %v1467_v14, %v1471_v13 }
 0x132   : > { %v1480_v29 = vpop.permute.xlu1 %1479  ;;  %v1475_v30 = vpop.permute.xlu0 %1474  ;;  %v478_v14 = vsel %vm1959_vm14, %v474_v28, %v459_v17 }
 0x133   : > { %v1482_v31 = vunpack.i.h.bf16 %v1480_v29  ;;  %v1481_v32 = vunpack.i.l.bf16 %v1480_v29  ;;  %v1477_v33 = vunpack.i.h.bf16 %v1475_v30  ;;  %v1476_v34 = vunpack.i.l.bf16 %v1475_v30 }
 0x135   : > { %v412_v48 = vsel %vm2421_vm11, %v1477_v33, %v1481_v32  ;;  %v414_v49 = vsel %vm2421_vm11, %v1482_v31, %v1476_v34  ;;  %v413_v50 = vsel %vm2421_vm11, %v1476_v34, %v1477_v33  ;;  %v411_v51 = vsel %vm2421_vm11, %v1481_v32, %v1482_v31 }
 0x136   : > { %v498_v53 = vpop.permute.xlu1 %497  ;;  %v496_v55 = vpop.permute.xlu0 %495  ;;  %v424_v56 = vsel %vm1951_vm12, %v412_v48, %v400_v39  ;;  %v426_v57 = vsel %vm1959_vm14, %v414_v49, %v398_v40  ;;  %v423_v58 = vsel %vm1955_vm13, %v413_v50, %v401_v46  ;;  %v425_v60 = vsel %vm1965_vm15, %v411_v51, %v399_v47 }
 0x137   : > { %v1324_v61 = vpack.c.bf16 %v1893_v37, %v424_v56  ;;  %v1340_v62 = vpack.c.bf16 %v1889_v36, %v426_v57  ;;  %v1326_v63 = vpack.c.bf16 %v1885_v35, %v423_v58  ;;  %v1342_v5 = vpack.c.bf16 %v1897_v38, %v425_v60 }
 0x138   : > { %v444_v12 = vsel %vm1969_vm9, %v400_v39, %v412_v48  ;;  %v446_v13 = vsel %vm1973_vm7, %v398_v40, %v414_v49  ;;  %v443_v35 = vsel %vm1977_vm8, %v401_v46, %v413_v50  ;;  %v445_v30 = vsel %vm2043_vm6, %v399_v47, %v411_v51 }
 0x139   : > { %1325 = vmatprep.subr.bf16.mxu0 %v1324_v61  ;;  %1341 = vmatprep.subr.bf16.mxu1 %v1340_v62  ;;  %v1328_v37 = vpack.c.bf16 %v476_v4, %v444_v12  ;;  %v1344_v36 = vpack.c.bf16 %v478_v14, %v446_v13  ;;  %v488_v31 = vsel %vm1969_vm9, %v461_v23, %v472_v26 }
 0x13a   : > { %v502_v15 = vpop.permute.xlu1 %501  ;;  %v500_v29 = vpop.permute.xlu0 %499  ;;  %1327 = vmatpush1.bf16.msra.mxu0 %v1326_v63  ;;  %1343 = vmatpush1.bf16.msra.mxu1 %v1342_v5  ;;  %v490_v32 = vsel %vm1973_vm7, %v459_v17, %v474_v28  ;;  %v1330_v33 = vpack.c.bf16 %v475_v10, %v443_v35  ;;  %v1346_v34 = vpack.c.bf16 %v477_v52, %v445_v30  ;;  %v1643_v30 = vmov 0  }
 0x13b   : > { %1329 = vmatprep.subr.bf16.mxu0 %v1328_v37  ;;  %1345 = vmatprep.subr.bf16.mxu1 %v1344_v36  ;;  %v1332_v39 = vpack.c.bf16 %v488_v31, %v1816_v3  ;;  %v1348_v23 = vpack.c.bf16 %v490_v32, %v1813_v2  ;;  %v487_v17 = vsel %vm1977_vm8, %v1991_v24, %v473_v27 }
 0x13c   : > { %v489_v26 = vsel %vm2043_vm6, %v1985_v18, %v1995_v25  ;;  %v1334_v2 = vpack.c.bf16 %v487_v17, %v1806_v1  ;;  %v505_v24 = vsel %vm397_vm10, %v496_v55, %v498_v53  ;;  %v506_v27 = vsel %vm397_vm10, %v502_v15, %v496_v55  ;;  %1483 = vset.pattern.permute.xlu1 %v1643_v30 }
 0x13d   : > { %v1350_v46 = vpack.c.bf16 %v489_v26, %v1803_v0  ;;  %v503_v18 = vsel %vm397_vm10, %v500_v29, %v502_v15  ;;  %v504_v25 = vsel %vm397_vm10, %v498_v53, %v500_v29  ;;  %1484 = vset.pattern.permute.xlu0 %v1643_v30 }
 0x13e   : > { %v510_v28 = vpop.permute.xlu1 %509  ;;  %v508_v40 = vpop.permute.xlu0 %507  ;;  %1331 = vmatpush1.bf16.msra.mxu0 %v1330_v33  ;;  %1347 = vmatpush1.bf16.msra.mxu1 %v1346_v34 }
 0x13f   : > { %1333 = vmatprep.subr.bf16.mxu0 %v1332_v39  ;;  %1349 = vmatprep.subr.bf16.mxu1 %v1348_v23  ;;  %v517_v3 = vsel %vm2421_vm11, %v508_v40, %v510_v28 }
 0x140   : > { %v519_v1 = vsel %vm1955_vm13, %v517_v3, %v506_v27 }
 0x141   : > { %v1338_v60 = vpack.c.bf16 %v1911_v41, %v519_v1  ;;  %v531_v41 = vsel %vm1977_vm8, %v506_v27, %v517_v3  ;;  %v722_v27 = vld [vmem:[%s2411_s3] sm:$0xff] }
 0x142   : > { %v514_v47 = vpop.permute.xlu1 %513  ;;  %v512_v48 = vpop.permute.xlu0 %511  ;;  %1335 = vmatpush1.bf16.msra.mxu0 %v1334_v2  ;;  %1351 = vmatpush1.bf16.msra.mxu1 %v1350_v46  ;;  %v721_v2 = vld [vmem:[%s2410_s2] sm:$0xff] }
 0x143   : > { %v518_v0 = vsel %vm2421_vm11, %v514_v47, %v508_v40  ;;  %v515_v49 = vsel %vm2421_vm11, %v512_v48, %v514_v47  ;;  %v516_v50 = vsel %vm2421_vm11, %v510_v28, %v512_v48  ;;  %vm575_vm11 = vcmask 588800  }
 0x144   : > { %v522_v51 = vsel %vm1959_vm14, %v518_v0, %v503_v18  ;;  %v520_v53 = vsel %vm1951_vm12, %v516_v50, %v505_v24  ;;  %v521_v55 = vsel %vm1965_vm15, %v515_v49, %v504_v25  ;;  %v532_v61 = vsel %vm1969_vm9, %v505_v24, %v516_v50 }
 0x145   : > { %v1336_v56 = vpack.c.bf16 %v1915_v42, %v520_v53  ;;  %v1352_v57 = vpack.c.bf16 %v1929_v44, %v522_v51  ;;  %v1354_v58 = vpack.c.bf16 %v1925_v43, %v521_v55  ;;  %v534_v62 = vsel %vm1973_vm7, %v503_v18, %v518_v0  ;;  %v338_v42 = vld [vmem:[%s2409_s1] sm:$0xff] }
 0x146   : > { %v533_v43 = vsel %vm2043_vm6, %v504_v25, %v515_v49 }
 0x147   : > { %1337 = vmatprep.subr.bf16.mxu0 %v1336_v56  ;;  %1353 = vmatprep.subr.bf16.mxu1 %v1352_v57 }
 0x148   : > { %1339 = vmatpush1.bf16.msra.mxu0 %v1338_v60  ;;  %1355 = vmatpush1.bf16.msra.mxu1 %v1354_v58 }
 0x149   : > { %595 = vmatprep.subr.mxu0 %v532_v61  ;;  %666 = vmatprep.subr.mxu1 %v534_v62 }
 0x14c   : > { %596 = vmatpush1.msra.mxu0 %v531_v41  ;;  %667 = vmatpush1.msra.mxu1 %v533_v43 }
 0x14d   : > { %1308 = vmatmul.mubr.msk.f32.vlgmr.msra.gmra.mrb[0].mxu0 %vm575_vm11, %v338_v42  ;;  %1309 = vmatmul.mubr.msk.f32.vlgmr.msra.gmra.mrb[0].mxu1 %vm575_vm11, %v338_v42 }
 0x14e   : > { %1057 = vmatprep.mubr.f32.mxu0 %v1642_v45  ;;  %1128 = vmatprep.mubr.f32.mxu1 %v1642_v45 }
 0x220   : > { %v645_v44 = vpop.f32.mrb[0].mxu0  ;;  %v716_v63 = vpop.f32.mrb[0].mxu1 }
 0x221   : > { %v647_v4 = vpop.f32.mrb[1].mxu0  ;;  %v718_v5 = vpop.f32.mrb[1].mxu1  ;;  %v727_v12 = vmul.f32 %v645_v44, %v645_v44  ;;  %v760_v13 = vmul.f32 %v716_v63, %v716_v63 }
 0x222   : > { %v723_v14 = vadd.f32 %v647_v4, %v645_v44  ;;  %v728_v37 = vmul.f32 %v647_v4, %v647_v4  ;;  %v756_v36 = vadd.f32 %v718_v5, %v716_v63  ;;  %v761_v35 = vmul.f32 %v718_v5, %v718_v5 }
 0x224   : > { %724 = vadd.xlane.f32.xlu0 %v723_v14  ;;  %v729_v15 = vadd.f32 %v728_v37, %v727_v12  ;;  %757 = vadd.xlane.f32.xlu1 %v756_v36  ;;  %v762_v29 = vadd.f32 %v761_v35, %v760_v13 }
 0x228   : > { %730 = vadd.xlane.f32.xlu0 %v729_v15 }
 0x22c   : > { %763 = vadd.xlane.f32.xlu0 %v762_v29 }
 0x2b1   : > { %v725_v45 = vpop.xlane.xlu0 %724  ;;  %v758_v31 = vpop.xlane.xlu1 %757 }
 0x2b2   : > { %v726_v32 = vmul.f32 0.00390625, %v725_v45  ;;  %v759_v10 = vmul.f32 0.00390625, %v758_v31 }
 0x2b4   : > { %v733_v33 = vmul.f32 %v726_v32, %v726_v32  ;;  %v766_v23 = vmul.f32 %v759_v10, %v759_v10 }
 0x2b5   : > { %v731_v52 = vpop.xlane.xlu0 %730 }
 0x2b6   : > { %v732_v34 = vmul.f32 0.00390625, %v731_v52 }
 0x2b8   : > { %v734_v39 = vsub.f32 %v732_v34, %v733_v33 }
 0x2b9   : > { %v764_v17 = vpop.xlane.xlu0 %763 }
 0x2ba   : > { %v735_v26 = vadd.f32 1e-05, %v734_v39  ;;  %v765_v28 = vmul.f32 0.00390625, %v764_v17 }
 0x2bc   : > { %1525 = vrsqrt.f32 %v735_v26  ;;  %v767_v40 = vsub.f32 %v765_v28, %v766_v23 }
 0x2be   : > { %v768_v3 = vadd.f32 1e-05, %v767_v40 }
 0x2c0   : > { %1527 = vrsqrt.f32 %v768_v3 }
 0x2c6   : > { %v1526_v46 = vpop.eup %1525 }
 0x2c7   : > { %v737_v24 = vmul.f32 %v1526_v46, %v721_v2 }
 0x2c9   : > { %742 = vperm.xlu1 %1483, %v737_v24   ;;  %v738_v18 = vmul.f32 %v737_v24, %v726_v32 }
 0x2ca   : > { %v1528_v25 = vpop.eup %1527 }
 0x2cb   : > { %v739_v47 = vsub.f32 %v722_v27, %v738_v18  ;;  %v770_v48 = vmul.f32 %v1528_v25, %v721_v2 }
 0x2cd   : > { %749 = vperm.xlu1 %1483, %v739_v47   ;;  %775 = vperm.xlu0 %1484, %v770_v48   ;;  %v771_v1 = vmul.f32 %v770_v48, %v759_v10 }
 0x2cf   : > { %v772_v0 = vsub.f32 %v722_v27, %v771_v1 }
 0x2d1   : > { %782 = vperm.xlu1 %1483, %v772_v0  }
 0x348   : > { %v743_v49 = vpop.permute.xlu1 %742 }
 0x349   : > { %v745_v50 = vmul.f32 %v743_v49, %v645_v44  ;;  %v746_v55 = vmul.f32 %v743_v49, %v647_v4 }
 0x34c   : > { %v750_v51 = vpop.permute.xlu1 %749  ;;  %v776_v53 = vpop.permute.xlu0 %775 }
 0x34d   : > { %v752_v56 = vadd.f32 %v750_v51, %v745_v50  ;;  %v753_v57 = vadd.f32 %v750_v51, %v746_v55  ;;  %v778_v60 = vmul.f32 %v776_v53, %v716_v63  ;;  %v779_v43 = vmul.f32 %v776_v53, %v718_v5 }
 0x34f   : > { %v2120_v58 = vmax.f32 %v752_v56, 0.0  ;;  %v2124_v42 = vmax.f32 %v753_v57, 0.0 }
 0x350   : > { %v783_v61 = vpop.permute.xlu1 %782 }
 0x351   : > { %v785_v62 = vadd.f32 %v783_v61, %v778_v60  ;;  %790 = vrot.lane.b32.xlu1 %v2120_v58, %s1638_s20  ;;  %v786_v44 = vadd.f32 %v783_v61, %v779_v43  ;;  %v1485_v63 = vpack.i.bf16 %v2124_v42, %v2120_v58 }
 0x353   : > { %v2126_v41 = vmax.f32 %v785_v62, 0.0  ;;  %v2137_v4 = vmax.f32 %v786_v44, 0.0 }
 0x355   : > { %792 = vrot.lane.b32.xlu1 %v2124_v42, %s1638_s20  ;;  %806 = vrot.lane.b32.xlu0 %v2126_v41, %s1639_s12  ;;  %v1490_v5 = vpack.i.bf16 %v2137_v4, %v2126_v41 }
 0x359   : > { %1486 = vrot.lane.b32.xlu0 %v1485_v63, %s1640_s22  ;;  %794 = vrot.lane.b32.xlu1 %v2126_v41, %s1638_s20 }
 0x35d   : > { %1496 = vrot.lane.b32.xlu0 %v1485_v63, %s1641_s23  ;;  %796 = vrot.lane.b32.xlu1 %v2137_v4, %s1638_s20 }
 0x361   : > { %802 = vrot.lane.b32.xlu1 %v2120_v58, %s1639_s12 }
 0x365   : > { %804 = vrot.lane.b32.xlu1 %v2124_v42, %s1639_s12 }
 0x369   : > { %808 = vrot.lane.b32.xlu1 %v2137_v4, %s1639_s12  ;;  %s1567_s12 = scalar_lea.vmem %s2356_s9, 512 }
 0x36a   : > { %p1568_p6 = scmp.ne.s32.totalorder %s2356_s9, %s1567_s12 }
 0x36c   : > { %p1569_p12 = pnand %p1568_p6, %p2458_p11 }
 0x36d   : > { %1491 = vrot.lane.b32.xlu1 %v1490_v5, %s1640_s22 }
 0x36e   : > { %p1570_p13 = pneg %p1569_p12 }
 0x371   : > { %1501 = vrot.lane.b32.xlu1 %v1490_v5, %s1641_s23 }
 0x3c3   : > { %v791_v12 = vpop.permute.xlu1 %790 }
 0x3c7   : > { %v793_v13 = vpop.permute.xlu1 %792  ;;  %v807_v35 = vpop.permute.xlu0 %806 }
 0x3c8   : > { %v800_v29 = vsel %vm347_vm1, %v791_v12, %v793_v13 }
 0x3cb   : > { %v795_v14 = vpop.permute.xlu1 %794 }
 0x3cc   : > { %v799_v34 = vsel %vm347_vm1, %v793_v13, %v795_v14 }
 0x3cf   : > { %v797_v37 = vpop.permute.xlu1 %796 }
 0x3d0   : > { %v801_v30 = vsel %vm347_vm1, %v797_v37, %v791_v12  ;;  %v798_v39 = vsel %vm347_vm1, %v795_v14, %v797_v37  ;;  %vm2443_vm1 = vcmp.eq.s32.totalorder %v1853_v19, 15 }
 0x3d3   : > { %v803_v36 = vpop.permute.xlu1 %802 }
 0x3d7   : > { %v805_v15 = vpop.permute.xlu1 %804 }
 0x3d8   : > { %v811_v45 = vsel %vm360_vm0, %v805_v15, %v807_v35  ;;  %v812_v31 = vsel %vm360_vm0, %v803_v36, %v805_v15 }
 0x3d9   : > { %v2162_v32 = vsel %vm325_vm2, %v812_v31, %v801_v30  ;;  %v2166_v10 = vsel %vm326_vm4, %v811_v45, %v800_v29  ;;  %v2193_v3 = vsel %vm2443_vm1, %v801_v30, %v812_v31  ;;  %vm2445_vm2 = vcmp.eq.s32.totalorder %v1857_v21, 15  ;;  %v1487_v21 = vpop.permute.xlu0 %1486 }
 0x3da   : > { %v1505_v52 = vpack.i.bf16 %v2166_v10, %v2162_v32  ;;  %v2204_v46 = vsel %vm2445_vm2, %v800_v29, %v811_v45  ;;  %v1489_v18 = vunpack.i.h.bf16 %v1487_v21  ;;  %v1488_v25 = vunpack.i.l.bf16 %v1487_v21 }
 0x3db   : > { %v809_v33 = vpop.permute.xlu1 %808  ;;  %vm2447_vm4 = vcmp.lt.s32.totalorder %v1838_v7, 127 }
 0x3dc   : > { %v810_v23 = vsel %vm360_vm0, %v807_v35, %v809_v33  ;;  %v813_v17 = vsel %vm360_vm0, %v809_v33, %v803_v36  ;;  %1506 = vrot.lane.b32.xlu0 %v1505_v52, %s1640_s22  ;;  %vm2444_vm0 = vcmp.eq.s32.totalorder %v1859_v22, 15  ;;  %v876_v43 = vsel %vm397_vm10, %v1488_v25, %v1489_v18  ;;  %vm2449_vm1 = vmmov %vm2447_vm4 }
 0x3dd   : > { %v2181_v26 = vsel %vm327_vm5, %v810_v23, %v799_v34  ;;  %v2185_v28 = vsel %vm328_vm3, %v813_v17, %v798_v39  ;;  %v2200_v2 = vsel %vm2444_vm0, %v799_v34, %v810_v23  ;;  %vm2446_vm3 = vcmp.eq.s32.totalorder %v1855_v20, 15  ;;  %v1497_v20 = vpop.permute.xlu0 %1496  ;;  %vm2448_vm5 = vmmov %vm2447_vm4 }
 0x3de   : > { %v1510_v40 = vpack.i.bf16 %v2185_v28, %v2181_v26  ;;  %v2212_v19 = vsel %vm2446_vm3, %v798_v39, %v813_v17  ;;  %v1499_v47 = vunpack.i.h.bf16 %v1497_v20  ;;  %v1498_v48 = vunpack.i.l.bf16 %v1497_v20  ;;  %vm2450_vm0 = vmmov %vm2449_vm1 }
 0x3df   : > { %v1492_v22 = vpop.permute.xlu1 %1491  ;;  %vm2451_vm2 = vmmov %vm2450_vm0 }
 0x3e0   : > { %1516 = vrot.lane.b32.xlu0 %v1505_v52, %s1641_s23  ;;  %1511 = vrot.lane.b32.xlu1 %v1510_v40, %s1640_s22  ;;  %v1494_v1 = vunpack.i.h.bf16 %v1492_v22  ;;  %v1493_v0 = vunpack.i.l.bf16 %v1492_v22  ;;  %v2228_v44 = vsel %vm2447_vm4, %v1498_v48, %v1499_v47  ;;  %vm2452_vm3 = vmmov %vm2450_vm0 }
 0x3e1   : > { %vm2453_vm4 = vmmov %vm2450_vm0 }
 0x3e2   : > { %v2232_v63 = vsel %vm397_vm10, %v1494_v1, %v1488_v25  ;;  %v874_v5 = vsel %vm397_vm10, %v1493_v0, %v1494_v1 }
 0x3e3   : > { %v1502_v24 = vpop.permute.xlu1 %1501 }
 0x3e4   : > { %910 = vrot.lane.b32.xlu0 %v2193_v3, %s1640_s22  ;;  %1521 = vrot.lane.b32.xlu1 %v1510_v40, %s1641_s23  ;;  %v1504_v49 = vunpack.i.h.bf16 %v1502_v24  ;;  %v1503_v53 = vunpack.i.l.bf16 %v1502_v24 }
 0x3e6   : > { %v889_v36 = vsel %vm2449_vm1, %v1504_v49, %v1498_v48  ;;  %v886_v35 = vsel %vm2450_vm0, %v1503_v53, %v1504_v49  ;;  %v887_v30 = vsel %vm2451_vm2, %v1499_v47, %v1503_v53  ;;  %vm2455_vm1 = vmmov %vm2450_vm0 }
 0x3e7   : > { %v891_v47 = vsel %vm1951_vm12, %v887_v30, %v876_v43  ;;  %v893_v48 = vsel %vm1959_vm14, %v889_v36, %v874_v5  ;;  %vm2457_vm2 = vmmov %vm2450_vm0 }
 0x3e8   : > { %914 = vrot.lane.b32.xlu0 %v2200_v2, %s1640_s22  ;;  %912 = vrot.lane.b32.xlu1 %v2204_v46, %s1640_s22 }
 0x3ec   : > { %922 = vrot.lane.b32.xlu0 %v2193_v3, %s1641_s23  ;;  %916 = vrot.lane.b32.xlu1 %v2212_v19, %s1640_s22  ;;  %s1644_s22 = smov [#allocation6]  }
 0x3f0   : > { %926 = vrot.lane.b32.xlu0 %v2200_v2, %s1641_s23  ;;  %924 = vrot.lane.b32.xlu1 %v2204_v46, %s1641_s23 }
 0x3f4   : > { %928 = vrot.lane.b32.xlu1 %v2212_v19, %s1641_s23  ;;  %s1571_s23 = sshll.u32 %s1644_s22, 4  ;;  %s1572_s23 = int_to_ptr.vmem [resolvable:$false] %s1571_s23 }
 0x3f5   : > { %s1573_s29 = scalar_lea.vmem %s1572_s23, 1024  ;;  %p1574_p8 = scmp.lt.s32.totalorder %s2356_s9, %s1572_s23 }
 0x3f6   : > { %p1575_p10 = scmp.lt.s32.totalorder %s1573_s29, %s1567_s12 }
 0x3f8   : > { %p1576_p0 = por %p1575_p10, %p1574_p8 }
 0x3fa   : > { %p1577_p2 = pnand %p1576_p0, %p1570_p13 }
 0x44e   : > { %v1507_v27 = vpop.permute.xlu0 %1506 }
 0x44f   : > { %v1509_v60 = vunpack.i.h.bf16 %v1507_v27  ;;  %v1508_v61 = vunpack.i.l.bf16 %v1507_v27 }
 0x451   : > { %v832_v45 = vsel %vm397_vm10, %v1508_v61, %v1509_v60 }
 0x452   : > { %v1517_v50 = vpop.permute.xlu0 %1516  ;;  %v1512_v51 = vpop.permute.xlu1 %1511 }
 0x453   : > { %v1519_v55 = vunpack.i.h.bf16 %v1517_v50  ;;  %v1518_v56 = vunpack.i.l.bf16 %v1517_v50  ;;  %v1514_v57 = vunpack.i.h.bf16 %v1512_v51  ;;  %v1513_v62 = vunpack.i.l.bf16 %v1512_v51 }
 0x455   : > { %v844_v12 = vsel %vm2448_vm5, %v1518_v56, %v1519_v55  ;;  %v833_v13 = vsel %vm397_vm10, %v1514_v57, %v1508_v61  ;;  %v830_v31 = vsel %vm397_vm10, %v1513_v62, %v1514_v57  ;;  %v831_v52 = vsel %vm397_vm10, %v1509_v60, %v1513_v62  ;;  %vm2454_vm5 = vmmov %vm2450_vm0 }
 0x456   : > { %v911_v14 = vpop.permute.xlu0 %910  ;;  %v1522_v37 = vpop.permute.xlu1 %1521  ;;  %v846_v23 = vsel %vm1955_vm13, %v844_v12, %v833_v13  ;;  %v858_v51 = vsel %vm1977_vm8, %v833_v13, %v844_v12  ;;  %v905_v57 = vsel %vm1973_vm7, %v874_v5, %v889_v36  ;;  %v890_v60 = vsel %vm1955_vm13, %v2228_v44, %v2232_v63 }
 0x457   : > { %v1524_v15 = vunpack.i.h.bf16 %v1522_v37  ;;  %v1523_v29 = vunpack.i.l.bf16 %v1522_v37  ;;  %v1358_v1 = vpack.c.bf16 %v2162_v32, %v846_v23  ;;  %v1380_v12 = vpack.c.bf16 %v905_v57, %v2137_v4  ;;  %v1136_v57 = vld [vmem:[%s2414_s6] sm:$0xff] }
 0x459   : > { %v845_v33 = vsel %vm2452_vm3, %v1524_v15, %v1518_v56  ;;  %v842_v34 = vsel %vm2453_vm4, %v1523_v29, %v1524_v15  ;;  %v843_v39 = vsel %vm2454_vm5, %v1519_v55, %v1523_v29  ;;  %v875_v55 = vsel %vm397_vm10, %v1489_v18, %v1493_v0 }
 0x45a   : > { %v915_v17 = vpop.permute.xlu0 %914  ;;  %v913_v40 = vpop.permute.xlu1 %912  ;;  %v847_v21 = vsel %vm1951_vm12, %v843_v39, %v832_v45  ;;  %v849_v22 = vsel %vm1959_vm14, %v845_v33, %v830_v31  ;;  %v848_v20 = vsel %vm1965_vm15, %v842_v34, %v831_v52  ;;  %v859_v24 = vsel %vm1969_vm9, %v832_v45, %v843_v39 }
 0x45b   : > { %v1356_v27 = vpack.c.bf16 %v2166_v10, %v847_v21  ;;  %v1372_v25 = vpack.c.bf16 %v2185_v28, %v849_v22  ;;  %v1374_v49 = vpack.c.bf16 %v2181_v26, %v848_v20  ;;  %v861_v50 = vsel %vm1973_vm7, %v830_v31, %v845_v33 }
 0x45c   : > { %v1360_v10 = vpack.c.bf16 %v891_v47, %v859_v24  ;;  %v1376_v28 = vpack.c.bf16 %v893_v48, %v861_v50  ;;  %v860_v53 = vsel %vm2043_vm6, %v831_v52, %v842_v34  ;;  %v903_v26 = vsel %vm1969_vm9, %v876_v43, %v887_v30 }
 0x45d   : > { %1357 = vmatprep.subr.bf16.mxu0 %v1356_v27  ;;  %1373 = vmatprep.subr.bf16.mxu1 %v1372_v25  ;;  %v892_v18 = vsel %vm1965_vm15, %v886_v35, %v875_v55  ;;  %v1362_v0 = vpack.c.bf16 %v890_v60, %v858_v51  ;;  %v1364_v62 = vpack.c.bf16 %v903_v26, %v2124_v42 }
 0x45e   : > { %v923_v56 = vpop.permute.xlu0 %922  ;;  %v917_v32 = vpop.permute.xlu1 %916  ;;  %1359 = vmatpush1.bf16.msra.mxu0 %v1358_v1  ;;  %1375 = vmatpush1.bf16.msra.mxu1 %v1374_v49  ;;  %v1378_v61 = vpack.c.bf16 %v892_v18, %v860_v53  ;;  %v902_v43 = vsel %vm1977_vm8, %v2232_v63, %v2228_v44  ;;  %v904_v5 = vsel %vm2043_vm6, %v875_v55, %v886_v35 }
 0x45f   : > { %1361 = vmatprep.subr.bf16.mxu0 %v1360_v10  ;;  %1377 = vmatprep.subr.bf16.mxu1 %v1376_v28  ;;  %v920_v36 = vsel %vm397_vm10, %v911_v14, %v913_v40  ;;  %v921_v44 = vsel %vm397_vm10, %v917_v32, %v911_v14  ;;  %v1366_v35 = vpack.c.bf16 %v902_v43, %v2120_v58 }
 0x460   : > { %v1382_v15 = vpack.c.bf16 %v904_v5, %v2126_v41  ;;  %v919_v31 = vsel %vm397_vm10, %v913_v40, %v915_v17  ;;  %v918_v14 = vsel %vm397_vm10, %v915_v17, %v917_v32 }
 0x462   : > { %v927_v13 = vpop.permute.xlu0 %926  ;;  %v925_v37 = vpop.permute.xlu1 %924  ;;  %1363 = vmatpush1.bf16.msra.mxu0 %v1362_v0  ;;  %1379 = vmatpush1.bf16.msra.mxu1 %v1378_v61 }
 0x463   : > { %v931_v42 = vsel %vm2455_vm1, %v925_v37, %v927_v13  ;;  %v932_v4 = vsel %vm2450_vm0, %v923_v56, %v925_v37  ;;  %1365 = vmatprep.subr.bf16.mxu0 %v1364_v62  ;;  %1381 = vmatprep.subr.bf16.mxu1 %v1380_v12 }
 0x464   : > { %v935_v63 = vsel %vm1951_vm12, %v931_v42, %v920_v36  ;;  %v934_v29 = vsel %vm1955_vm13, %v932_v4, %v921_v44  ;;  %vm2456_vm12 = vmmov %vm2450_vm0  ;;  %v947_v34 = vsel %vm1969_vm9, %v920_v36, %v931_v42  ;;  %v946_v6 = vsel %vm1977_vm8, %v921_v44, %v932_v4  ;;  %v1533_v44 = vld [vmem:[%s1796_s15] sm:$0xff] }
 0x465   : > { %v1368_v30 = vpack.c.bf16 %v2204_v46, %v935_v63  ;;  %v1370_v59 = vpack.c.bf16 %v2193_v3, %v934_v29 }
 0x466   : > { %v929_v45 = vpop.permute.xlu1 %928  ;;  %1367 = vmatpush1.bf16.msra.mxu0 %v1366_v35  ;;  %1383 = vmatpush1.bf16.msra.mxu1 %v1382_v15  ;;  %v1534_v35 = vld [vmem:[%s1796_s15 + $0x8] sm:$0xff] }
 0x467   : > { %v930_v54 = vsel %vm2456_vm12, %v927_v13, %v929_v45  ;;  %v933_v58 = vsel %vm2457_vm2, %v929_v45, %v923_v56  ;;  %1369 = vmatprep.subr.bf16.mxu0 %v1368_v30  ;;  %v1135_v56 = vld [vmem:[%s2413_s5] sm:$0xff] }
 0x468   : > { %v936_v41 = vsel %vm1965_vm15, %v930_v54, %v919_v31  ;;  %v937_v46 = vsel %vm1959_vm14, %v933_v58, %v918_v14  ;;  %v949_v7 = vsel %vm1973_vm7, %v918_v14, %v933_v58  ;;  %v948_v9 = vsel %vm2043_vm6, %v919_v31, %v930_v54  ;;  %v1535_v54 = vld [vmem:[%s1796_s15 + $0x10] sm:$0xff] }
 0x469   : > { %v1386_v52 = vpack.c.bf16 %v2200_v2, %v936_v41  ;;  %v1384_v33 = vpack.c.bf16 %v2212_v19, %v937_v46 }
 0x46a   : > { %1371 = vmatpush1.bf16.msra.mxu0 %v1370_v59  ;;  %v1536_v59 = vld [vmem:[%s1796_s15 + $0x18] sm:$0xff] }
 0x46b   : > { %1009 = vmatprep.subr.mxu0 %v947_v34  ;;  %1385 = vmatprep.subr.bf16.mxu1 %v1384_v33 }
 0x46c   : > { %1387 = vmatpush1.bf16.msra.mxu1 %v1386_v52 }
 0x46d   : > { %1080 = vmatprep.subr.mxu1 %v949_v7 }
 0x46e   : > { %1010 = vmatpush1.msra.mxu0 %v946_v6 }
 0x46f   : > { %1310 = vmatmul.mubr.msk.f32.vlgmr.msra.gmra.mrb[2].mxu0 %vm575_vm11, %v789_v8 }
 0x470   : > { %1081 = vmatpush1.msra.mxu1 %v948_v9 }
 0x471   : > { %1311 = vmatmul.mubr.msk.f32.vlgmr.msra.gmra.mrb[2].mxu1 %vm575_vm11, %v789_v8 }
 0x542   : > { %v1059_v3 = vpop.f32.mrb[2].mxu0 }
 0x543   : > { %v1061_v11 = vpop.f32.mrb[3].mxu0  ;;  %v1141_v2 = vmul.f32 %v1059_v3, %v1059_v3 }
 0x544   : > { %v1142_v19 = vmul.f32 %v1061_v11, %v1061_v11  ;;  %v1137_v39 = vadd.f32 %v1061_v11, %v1059_v3  ;;  %v1130_v23 = vpop.f32.mrb[2].mxu1 }
 0x545   : > { %v1132_v17 = vpop.f32.mrb[3].mxu1  ;;  %v1176_v40 = vmul.f32 %v1130_v23, %v1130_v23 }
 0x546   : > { %1138 = vadd.xlane.f32.xlu0 %v1137_v39  ;;  %v1177_v16 = vmul.f32 %v1132_v17, %v1132_v17  ;;  %v1143_v21 = vadd.f32 %v1142_v19, %v1141_v2  ;;  %v1172_v22 = vadd.f32 %v1132_v17, %v1130_v23 }
 0x548   : > { %1173 = vadd.xlane.f32.xlu1 %v1172_v22  ;;  %v1178_v20 = vadd.f32 %v1177_v16, %v1176_v40 }
 0x54a   : > { %1144 = vadd.xlane.f32.xlu0 %v1143_v21 }
 0x54e   : > { %1179 = vadd.xlane.f32.xlu0 %v1178_v20 }
 0x5d3   : > { %v1139_v38 = vpop.xlane.xlu0 %1138 }
 0x5d4   : > { %v1140_v24 = vmul.f32 0.00390625, %v1139_v38 }
 0x5d5   : > { %v1174_v27 = vpop.xlane.xlu1 %1173 }
 0x5d6   : > { %v1175_v25 = vmul.f32 0.00390625, %v1174_v27  ;;  %v1147_v48 = vmul.f32 %v1140_v24, %v1140_v24 }
 0x5d7   : > { %v1145_v47 = vpop.xlane.xlu0 %1144 }
 0x5d8   : > { %v1146_v1 = vmul.f32 0.00390625, %v1145_v47  ;;  %v1182_v50 = vmul.f32 %v1175_v25, %v1175_v25 }
 0x5da   : > { %v1148_v49 = vsub.f32 %v1146_v1, %v1147_v48 }
 0x5db   : > { %v1180_v51 = vpop.xlane.xlu0 %1179 }
 0x5dc   : > { %v1149_v10 = vadd.f32 1e-05, %v1148_v49  ;;  %v1181_v28 = vmul.f32 0.00390625, %v1180_v51 }
 0x5de   : > { %1529 = vrsqrt.f32 %v1149_v10  ;;  %v1183_v53 = vsub.f32 %v1181_v28, %v1182_v50 }
 0x5e0   : > { %v1184_v55 = vadd.f32 1e-05, %v1183_v53 }
 0x5e2   : > { %1531 = vrsqrt.f32 %v1184_v55 }
 0x5e8   : > { %v1530_v32 = vpop.eup %1529 }
 0x5e9   : > { %v1151_v26 = vmul.f32 %v1530_v32, %v1135_v56 }
 0x5eb   : > { %1156 = vperm.xlu1 %1483, %v1151_v26   ;;  %v1152_v60 = vmul.f32 %v1151_v26, %v1140_v24 }
 0x5ec   : > { %v1532_v18 = vpop.eup %1531 }
 0x5ed   : > { %v1153_v0 = vsub.f32 %v1136_v57, %v1152_v60  ;;  %v1186_v61 = vmul.f32 %v1532_v18, %v1135_v56 }
 0x5ef   : > { %1163 = vperm.xlu0 %1484, %v1153_v0   ;;  %1191 = vperm.xlu1 %1483, %v1186_v61   ;;  %v1187_v62 = vmul.f32 %v1186_v61, %v1175_v25 }
 0x5f1   : > { %v1188_v12 = vsub.f32 %v1136_v57, %v1187_v62 }
 0x5f3   : > { %1198 = vperm.xlu1 %1483, %v1188_v12  }
 0x66a   : > { %v1157_v43 = vpop.permute.xlu1 %1156 }
 0x66b   : > { %v1159_v5 = vmul.f32 %v1157_v43, %v1059_v3  ;;  %v1160_v13 = vmul.f32 %v1157_v43, %v1061_v11 }
 0x66e   : > { %v1164_v37 = vpop.permute.xlu0 %1163  ;;  %v1192_v36 = vpop.permute.xlu1 %1191 }
 0x66f   : > { %v1166_v42 = vadd.f32 %v1164_v37, %v1159_v5  ;;  %v1167_v4 = vadd.f32 %v1164_v37, %v1160_v13  ;;  %v1194_v29 = vmul.f32 %v1192_v36, %v1130_v23  ;;  %v1195_v30 = vmul.f32 %v1192_v36, %v1132_v17 }
 0x671   : > { %v1168_v63 = vadd.f32 %v1533_v44, %v1166_v42  ;;  %v1169_v15 = vadd.f32 %v1534_v35, %v1167_v4 }
 0x672   : > { %v1199_v45 = vpop.permute.xlu1 %1198 }
 0x673   : > { %1170 = vst [vmem:[%s297_s21] sm:$0xff] %v1168_v63  ;;  %1171 = vst [vmem:[%s297_s21 + $0x8] sm:$0xff] %v1169_v15  ;;  %v1201_v31 = vadd.f32 %v1199_v45, %v1194_v29  ;;  %v1202_v14 = vadd.f32 %v1199_v45, %v1195_v30 }
 0x675   : > { %v1203_v58 = vadd.f32 %v1535_v54, %v1201_v31  ;;  %v1204_v41 = vadd.f32 %v1536_v59, %v1202_v14 }
 0x677   : > { %1312 = vst [vmem:[%s297_s21 + $0x10] sm:$0xff] %v1203_v58  ;;  %1313 = vst [vmem:[%s297_s21 + $0x18] sm:$0xff] %v1204_v41 }
 0x678   : > { %1580 = shalt.err (!%p1577_p2)
}
 0x679   : > { %s1581_s15 = scalar_lea.hbm %s2363_s18, 512  ;;  %s1585_s8 = scalar_lea.hbm %s2415_s7, 1024 }
 0x67a   : > { %p1582_p4 = scmp.ne.s32.totalorder %s2363_s18, %s1581_s15  ;;  %p1586_p9 = scmp.lt.u32.totalorder %s2363_s18, %s2415_s7 }
 0x67b   : > { %p1587_p1 = scmp.lt.u32.totalorder %s1585_s8, %s1581_s15  ;;  %p1589_p6 = scmp.lt.u32.totalorder %s1581_s15, %s2363_s18 }
 0x67c   : > { %p1583_p5 = pnand %p1582_p4, %p2458_p11 }
 0x67d   : > { %p1588_p3 = por %p1587_p1, %p1586_p9 }
 0x67e   : > { %p1584_p7 = pneg %p1583_p5 }
 0x67f   : > { %p1590_p12 = por %p1589_p6, %p1588_p3 }
 0x681   : > { %p1591_p13 = pnand %p1590_p12, %p1584_p7 }
 0x683   : > { %1594 = shalt.err (!%p1591_p13)
}
 0x684   : > { %s1645_s12 = smov 256  }
 0x685   : > { %1390 = dma.vmem_to_hbm [thread:$0]  (%p2458_p11), %s2356_s9, 512, %s2363_s18, %s1209_s28, %s1645_s12, %s1645_s12, %s1638_s20  }
 0x686 PF: > { %s1238_s22 = sand.u32 1, %s1621_s24   ;;  %p2459_p8 = scmp.ne.s32.totalorder %s2425_s14, 0 }
 0x687   : > { %p2460_p10 = scmp.ge.s32.totalorder %s1633_s27, 2  ;;  %s1239_s23 = scalar_lea.sflag [#allocation5], %s1238_s22 }
 0x689   : > { %p1397_p0 = pnand %p2460_p10, %p2459_p8 }
 0x68b   : > { %1616 = dma.done.wait (!%p1397_p0), %s1239_s23, 512  }
 0x68c   : > { %1618 = vsyncadd (!%p1397_p0), %s1239_s23, 4294966784  ;;  %p20_p2 = scmp.ge.s32.totalorder %s1711_s30, 4   ;;  %s2461_s24 = smov %s1625_s25 }
 0x68d   : > { %s2462_s25 = smov %s1629_s26  ;;  %s2463_s26 = smov %s1723_s10 }
 0x68e   : > { %s2464_s27 = smov %s1711_s30  ;;  %22 = sbr.rel (!%p20_p2) target bundleno = 5 (0x5), region = 95 }
 0x695   :  { %1244 = vsyncpa [#allocation4], 1 }
 0x696   :  { %1246 = vsyncpa [#allocation4 + $0x1], 1 }
 0x697   :  { %1247 = vsyncpa [#allocation5], 1 }
 0x698   :  { %1249 = vsyncpa [#allocation5 + $0x1], 1 }

</bundles_post_ra>
